<compile_context>
chip_gen: v6e
topology: v6e:2x2x1
jax: 0.10.0
libtpu: 0.0.40
codegen_flags: <defaults>
</compile_context>

<pallas_src>
import math

import jax
import jax.numpy as jnp
from jax.experimental import pallas as pl
from jax.experimental.pallas import tpu as pltpu

# ---------------- synthetic "BERT" config ----------------
VOCAB = 128
TYPE_VOCAB = 2
MAX_POS = 32
HIDDEN = 32
HEADS = 2
HEAD_DIM = HIDDEN // HEADS
INTERMEDIATE = 64
LAYERS = 2
NUM_LABELS = 3
LABEL_PAD = 128          # lane-dense classifier/logits width; sliced back in JAX
LN_EPS = 1e-12
NEG_INF = -1e30


# ---------------- fused Pallas kernel ----------------
def _layernorm(v, g, b):
    mu = jnp.mean(v, axis=-1, keepdims=True)
    var = jnp.mean((v - mu) ** 2, axis=-1, keepdims=True)
    return (v - mu) * jax.lax.rsqrt(var + LN_EPS) * g + b


def _bert_fused_kernel(x_ref, mask_ref, emb_g_ref, emb_b_ref,
                       qkv_w_ref, qkv_b_ref, o_w_ref, o_b_ref,
                       ln1_g_ref, ln1_b_ref,
                       f1_w_ref, f1_b_ref, f2_w_ref, f2_b_ref,
                       ln2_g_ref, ln2_b_ref,
                       clf_w_ref, clf_b_ref, onehot_ref,
                       seq_ref, logits_ref, loss_ref):
    B, S = mask_ref.shape
    T = B * S
    HB = HEADS * B
    scale = 1.0 / math.sqrt(HEAD_DIM)

    # embeddings were summed in JAX; LayerNorm here (f32)
    x = _layernorm(x_ref[...], emb_g_ref[...], emb_b_ref[...])          # [T, H] f32

    # Hoisted mask: fully-broadcast [HEADS*B, S, S] selector built ONCE.
    mask_hb = jnp.concatenate([mask_ref[...]] * HEADS, axis=0)          # [HB, S]
    key_valid = jnp.broadcast_to(mask_hb[:, None, :], (HB, S, S)) > 0.5

    def head_stack(mat2d, col0):
        # [T, 3H] columns -> [HEADS*B, S, HEAD_DIM], batch index = h*B + b (head-major).
        parts = [
            mat2d[:, col0 + h * HEAD_DIM: col0 + (h + 1) * HEAD_DIM].reshape(B, S, HEAD_DIM)
            for h in range(HEADS)
        ]
        return jnp.concatenate(parts, axis=0)

    for l in range(LAYERS):          # static unroll; all weights stay VMEM-resident
        # ---- fused QKV: one bf16 [T,H] @ [H,3H] MXU matmul, f32 accumulate ----
        qkv = jnp.dot(x.astype(jnp.bfloat16), qkv_w_ref[l],
                      preferred_element_type=jnp.float32) + qkv_b_ref[l]      # [T, 3H]

        # heads folded into the single batch axis of the attention einsums
        q = head_stack(qkv, 0 * HIDDEN).astype(jnp.bfloat16)             # [HB, S, Dh]
        k = head_stack(qkv, 1 * HIDDEN).astype(jnp.bfloat16)
        v = head_stack(qkv, 2 * HIDDEN).astype(jnp.bfloat16)

        # ---- attention for ALL heads & batches in one batched einsum ----
        s = jnp.einsum("bqd,bkd->bqk", q, k,
                       preferred_element_type=jnp.float32) * scale       # [HB, S, S]
        s = jnp.where(key_valid, s, NEG_INF)     # select-mask: NaN-safe if fully masked
        s = s - jnp.max(s, axis=-1, keepdims=True)
        p = jnp.exp(s)
        p = p * pl.reciprocal(jnp.sum(p, axis=-1, keepdims=True), approx=True)
        ctx = jnp.einsum("bqk,bkd->bqd", p.astype(jnp.bfloat16), v,
                         preferred_element_type=jnp.float32)              # [HB, S, Dh]

        # ---- output projection: ONE batched einsum over heads + leading-axis sum
        #      (concat_h(ctx_h) @ Wo  ==  sum_h ctx_h @ Wo[h*Dh:(h+1)*Dh, :]) ----
        ctx_h = ctx.reshape(HEADS, T, HEAD_DIM).astype(jnp.bfloat16)      # leading regroup
        attn = jnp.sum(jnp.einsum("htd,hdj->htj", ctx_h, o_w_ref[l],
                                  preferred_element_type=jnp.float32), axis=0)
        attn = attn + o_b_ref[l]
        x = _layernorm(attn + x, ln1_g_ref[l], ln1_b_ref[l])

        # ---- FFN (bf16 matmuls, f32 elementwise) ----
        hmid = jnp.dot(x.astype(jnp.bfloat16), f1_w_ref[l],
                       preferred_element_type=jnp.float32) + f1_b_ref[l]
        # TODO(synk): HF BERT default is exact erf-GELU; tanh approximation used here.
        hmid = jax.nn.gelu(hmid, approximate=True)
        ffn = jnp.dot(hmid.astype(jnp.bfloat16), f2_w_ref[l],
                      preferred_element_type=jnp.float32) + f2_b_ref[l]
        x = _layernorm(ffn + x, ln2_g_ref[l], ln2_b_ref[l])

    # TODO(synk): a lane-dense [B, S*HIDDEN] repack of the sequence output needs a
    #             sublane->lane reshape; kept the proven [T, HIDDEN] layout at toy size.
    seq_ref[...] = x                                                      # [T, H]

    # ---- classifier on [CLS] rows: single strided access (dropout = identity/eval) ----
    cls = x.reshape(B, S, HIDDEN)[:, 0:1, :].reshape(B, HIDDEN)
    logits = jnp.dot(cls.astype(jnp.bfloat16), clf_w_ref[...],
                     preferred_element_type=jnp.float32) + clf_b_ref[...]  # [B, 128]
    logits_ref[...] = logits                                              # lane-dense store

    # ---- cross-entropy over the first NUM_LABELS columns (padding masked out) ----
    valid = jax.lax.broadcasted_iota(jnp.int32, (1, LABEL_PAD), 1) < NUM_LABELS
    z = jnp.where(valid, logits, NEG_INF)
    m = jnp.max(z, axis=-1, keepdims=True)
    lse = jnp.log(jnp.sum(jnp.exp(z - m), axis=-1, keepdims=True)) + m
    tgt = jnp.sum(onehot_ref[...] * logits, axis=-1, keepdims=True)
    loss_ref[...] = jnp.mean(lse - tgt, keepdims=True)                    # [1, 1]


def _fused_forward_call(x_emb, mask_f32, packed, onehot):
    T, H = x_emb.shape
    B, _ = mask_f32.shape
    n_inputs = 2 + len(packed) + 1
    vmem = lambda: pl.BlockSpec(memory_space=pltpu.MemorySpace.VMEM)
    # Single-block pallas_call (no grid): every operand mapped whole into VMEM.
    return pl.pallas_call(
        _bert_fused_kernel,
        out_shape=(
            jax.ShapeDtypeStruct((T, H), jnp.float32),           # sequence output
            jax.ShapeDtypeStruct((B, LABEL_PAD), jnp.float32),   # padded logits
            jax.ShapeDtypeStruct((1, 1), jnp.float32),           # loss
        ),
        in_specs=[vmem() for _ in range(n_inputs)],
        out_specs=(vmem(), vmem(), vmem()),
        compiler_params=pltpu.CompilerParams(vmem_limit_bytes=64 * 1024 * 1024),
        cost_estimate=pl.CostEstimate(flops=575_000, transcendentals=3_000,
                                      bytes_accessed=60_000),
    )(x_emb, mask_f32, *packed, onehot)


# ---------------- parameter init (deterministic) + packing ----------------
def _dense(key, fan_in, fan_out):
    w = jax.random.normal(key, (fan_in, fan_out), jnp.float32) * 0.02
    b = jnp.zeros((fan_out,), jnp.float32)
    return w, b


def init_params(seed=0):
    key = jax.random.PRNGKey(seed)
    keys = iter(jax.random.split(key, 64))
    p = {
        "word_emb": jax.random.normal(next(keys), (VOCAB, HIDDEN), jnp.float32) * 0.02,
        "pos_emb": jax.random.normal(next(keys), (MAX_POS, HIDDEN), jnp.float32) * 0.02,
        "type_emb": jax.random.normal(next(keys), (TYPE_VOCAB, HIDDEN), jnp.float32) * 0.02,
        "emb_ln_g": jnp.ones((HIDDEN,), jnp.float32),
        "emb_ln_b": jnp.zeros((HIDDEN,), jnp.float32),
        "layers": [],
    }
    for _ in range(LAYERS):
        layer = {
            "q": _dense(next(keys), HIDDEN, HIDDEN),
            "k": _dense(next(keys), HIDDEN, HIDDEN),
            "v": _dense(next(keys), HIDDEN, HIDDEN),
            "o": _dense(next(keys), HIDDEN, HIDDEN),
            "ln1_g": jnp.ones((HIDDEN,), jnp.float32),
            "ln1_b": jnp.zeros((HIDDEN,), jnp.float32),
            "ffn1": _dense(next(keys), HIDDEN, INTERMEDIATE),
            "ffn2": _dense(next(keys), INTERMEDIATE, HIDDEN),
            "ln2_g": jnp.ones((HIDDEN,), jnp.float32),
            "ln2_b": jnp.zeros((HIDDEN,), jnp.float32),
        }
        p["layers"].append(layer)
    p["classifier"] = _dense(next(keys), HIDDEN, NUM_LABELS)
    return p


def pack_params(p):
    """Stack per-layer weights on a leading LAYERS axis, fuse QKV, cast matmul
    weights to bf16 (MXU-native), pre-split o_w per head, pad classifier lane-dense."""
    def stack(fn):
        return jnp.stack([fn(l) for l in p["layers"]], axis=0)

    qkv_w = stack(lambda l: jnp.concatenate([l["q"][0], l["k"][0], l["v"][0]], axis=1))
    qkv_b = stack(lambda l: jnp.concatenate([l["q"][1], l["k"][1], l["v"][1]], axis=0)[None, :])
    # o_w pre-shaped [LAYERS, HEADS, HEAD_DIM, HIDDEN] so the kernel needs no reshape.
    o_w = stack(lambda l: l["o"][0].reshape(HEADS, HEAD_DIM, HIDDEN))
    o_b = stack(lambda l: l["o"][1][None, :])
    ln1_g = stack(lambda l: l["ln1_g"][None, :])
    ln1_b = stack(lambda l: l["ln1_b"][None, :])
    f1_w = stack(lambda l: l["ffn1"][0])
    f1_b = stack(lambda l: l["ffn1"][1][None, :])
    f2_w = stack(lambda l: l["ffn2"][0])
    f2_b = stack(lambda l: l["ffn2"][1][None, :])
    ln2_g = stack(lambda l: l["ln2_g"][None, :])
    ln2_b = stack(lambda l: l["ln2_b"][None, :])

    clf_w = jnp.zeros((HIDDEN, LABEL_PAD), jnp.float32).at[:, :NUM_LABELS].set(p["classifier"][0])
    clf_b = jnp.zeros((1, LABEL_PAD), jnp.float32).at[0, :NUM_LABELS].set(p["classifier"][1])

    bf16 = jnp.bfloat16
    return (p["emb_ln_g"][None, :], p["emb_ln_b"][None, :],
            qkv_w.astype(bf16), qkv_b, o_w.astype(bf16), o_b, ln1_g, ln1_b,
            f1_w.astype(bf16), f1_b, f2_w.astype(bf16), f2_b, ln2_g, ln2_b,
            clf_w.astype(bf16), clf_b)


# ---------------- forward pass ----------------
def forward(params, packed, input_ids, attention_mask, token_type_ids, labels=None):
    B, S = input_ids.shape
    # embedding gathers are JAX glue; everything else runs in the fused kernel
    x = (params["word_emb"][input_ids]
         + params["pos_emb"][jnp.arange(S)][None, :, :]
         + params["type_emb"][token_type_ids])
    x = x.reshape(B * S, HIDDEN).astype(jnp.float32)
    mask = attention_mask.astype(jnp.float32)

    if labels is not None:
        onehot = jax.nn.one_hot(labels.reshape(-1), LABEL_PAD, dtype=jnp.float32)
    else:
        onehot = jnp.zeros((B, LABEL_PAD), jnp.float32)

    seq, logits_pad, loss2d = _fused_forward_call(x, mask, packed, onehot)

    logits = logits_pad[:, :NUM_LABELS]
    sequence_output = seq.reshape(B, S, HIDDEN)
    loss = loss2d[0, 0] if labels is not None else None
    return logits, loss, sequence_output


# ---------------- demo ----------------
if __name__ == "__main__":
    B, S = 2, 8
    key = jax.random.PRNGKey(0)
    k_ids, k_lbl = jax.random.split(key)

    input_ids = jax.random.randint(k_ids, (B, S), 0, VOCAB, dtype=jnp.int32)
    attention_mask = jnp.array(
        [[1, 1, 1, 1, 1, 1, 1, 1],
         [1, 1, 1, 1, 1, 1, 0, 0]], dtype=jnp.int32)
    token_type_ids = jnp.zeros((B, S), dtype=jnp.int32)
    labels = jax.random.randint(k_lbl, (B,), 0, NUM_LABELS, dtype=jnp.int32)

    params = init_params(seed=0)
    packed = pack_params(params)

    logits, loss, seq_out = forward(params, packed, input_ids, attention_mask,
                                    token_type_ids, labels)
    jax.block_until_ready((logits, loss, seq_out))

    assert logits.shape == (B, NUM_LABELS)
    assert seq_out.shape == (B, S, HIDDEN)
    assert bool(jnp.all(jnp.isfinite(logits)))
    assert bool(jnp.all(jnp.isfinite(seq_out)))
    assert bool(jnp.isfinite(loss))
    print("KERNEL_OK")
</pallas_src>

<mosaic_0001>
module attributes {stable_mosaic.version = 11 : i64} {
  func.func @_bert_fused_kernel(%arg0: memref<16x32xf32, #tpu.memory_space<vmem>>, %arg1: memref<2x8xf32, #tpu.memory_space<vmem>>, %arg2: memref<1x32xf32, #tpu.memory_space<vmem>>, %arg3: memref<1x32xf32, #tpu.memory_space<vmem>>, %arg4: memref<2x32x96xbf16, #tpu.memory_space<vmem>>, %arg5: memref<2x1x96xf32, #tpu.memory_space<vmem>>, %arg6: memref<2x2x16x32xbf16, #tpu.memory_space<vmem>>, %arg7: memref<2x1x32xf32, #tpu.memory_space<vmem>>, %arg8: memref<2x1x32xf32, #tpu.memory_space<vmem>>, %arg9: memref<2x1x32xf32, #tpu.memory_space<vmem>>, %arg10: memref<2x32x64xbf16, #tpu.memory_space<vmem>>, %arg11: memref<2x1x64xf32, #tpu.memory_space<vmem>>, %arg12: memref<2x64x32xbf16, #tpu.memory_space<vmem>>, %arg13: memref<2x1x32xf32, #tpu.memory_space<vmem>>, %arg14: memref<2x1x32xf32, #tpu.memory_space<vmem>>, %arg15: memref<2x1x32xf32, #tpu.memory_space<vmem>>, %arg16: memref<32x128xbf16, #tpu.memory_space<vmem>>, %arg17: memref<1x128xf32, #tpu.memory_space<vmem>>, %arg18: memref<2x128xf32, #tpu.memory_space<vmem>>, %arg19: memref<16x32xf32, #tpu.memory_space<vmem>>, %arg20: memref<2x128xf32, #tpu.memory_space<vmem>>, %arg21: memref<1x1xf32, #tpu.memory_space<vmem>>) attributes {dimension_semantics = [], scalar_prefetch = 0 : i64, scratch_operands = 0 : i64, tpu.core_type = #tpu.core_type<tc>} {
    %c0 = arith.constant 0 : index
    %c0_0 = arith.constant 0 : index
    %0 = vector.load %arg0[%c0, %c0_0] : memref<16x32xf32, #tpu.memory_space<vmem>>, vector<16x32xf32>
    %c0_1 = arith.constant 0 : index
    %c0_2 = arith.constant 0 : index
    %1 = vector.load %arg2[%c0_1, %c0_2] : memref<1x32xf32, #tpu.memory_space<vmem>>, vector<1x32xf32>
    %c0_3 = arith.constant 0 : index
    %c0_4 = arith.constant 0 : index
    %2 = vector.load %arg3[%c0_3, %c0_4] : memref<1x32xf32, #tpu.memory_space<vmem>>, vector<1x32xf32>
    %cst = arith.constant dense<0.000000e+00> : vector<16xf32>
    %3 = vector.multi_reduction <add>, %0, %cst [1] : vector<16x32xf32> to vector<16xf32>
    %4 = vector.shape_cast %3 : vector<16xf32> to vector<16x1xf32>
    %cst_5 = arith.constant 3.200000e+01 : f32
    %5 = vector.broadcast %cst_5 : f32 to vector<16x1xf32>
    %6 = arith.divf %4, %5 : vector<16x1xf32>
    %7 = vector.broadcast %6 : vector<16x1xf32> to vector<16x32xf32>
    %8 = arith.subf %0, %7 : vector<16x32xf32>
    %9 = arith.mulf %8, %8 : vector<16x32xf32>
    %cst_6 = arith.constant dense<0.000000e+00> : vector<16xf32>
    %10 = vector.multi_reduction <add>, %9, %cst_6 [1] : vector<16x32xf32> to vector<16xf32>
    %11 = vector.shape_cast %10 : vector<16xf32> to vector<16x1xf32>
    %cst_7 = arith.constant 3.200000e+01 : f32
    %12 = vector.broadcast %cst_7 : f32 to vector<16x1xf32>
    %13 = arith.divf %11, %12 : vector<16x1xf32>
    %14 = vector.broadcast %6 : vector<16x1xf32> to vector<16x32xf32>
    %15 = arith.subf %0, %14 : vector<16x32xf32>
    %cst_8 = arith.constant 9.99999996E-13 : f32
    %16 = vector.broadcast %cst_8 : f32 to vector<16x1xf32>
    %17 = arith.addf %13, %16 : vector<16x1xf32>
    %18 = math.rsqrt %17 : vector<16x1xf32>
    %19 = vector.broadcast %18 : vector<16x1xf32> to vector<16x32xf32>
    %20 = arith.mulf %15, %19 : vector<16x32xf32>
    %21 = vector.broadcast %1 : vector<1x32xf32> to vector<16x32xf32>
    %22 = arith.mulf %20, %21 : vector<16x32xf32>
    %23 = vector.broadcast %2 : vector<1x32xf32> to vector<16x32xf32>
    %24 = arith.addf %22, %23 : vector<16x32xf32>
    %c0_9 = arith.constant 0 : index
    %c0_10 = arith.constant 0 : index
    %25 = vector.load %arg1[%c0_9, %c0_10] : memref<2x8xf32, #tpu.memory_space<vmem>>, vector<2x8xf32>
    %26 = tpu.concatenate %25, %25 in 0 : vector<2x8xf32>, vector<2x8xf32> -> vector<4x8xf32>
    %27 = vector.shape_cast %26 : vector<4x8xf32> to vector<4x1x8xf32>
    %28 = vector.shape_cast %27 : vector<4x1x8xf32> to vector<4x1x8xf32>
    %29 = vector.broadcast %28 : vector<4x1x8xf32> to vector<4x8x8xf32>
    %cst_11 = arith.constant 5.000000e-01 : f32
    %30 = vector.broadcast %cst_11 : f32 to vector<4x8x8xf32>
    %31 = arith.cmpf ogt, %29, %30 : vector<4x8x8xf32>
    %32 = arith.truncf %24 : vector<16x32xf32> to vector<16x32xbf16>
    %c0_12 = arith.constant 0 : index
    %c0_13 = arith.constant 0 : index
    %c0_14 = arith.constant 0 : index
    %33 = vector.load %arg4[%c0_12, %c0_13, %c0_14] : memref<2x32x96xbf16, #tpu.memory_space<vmem>>, vector<1x32x96xbf16>
    %34 = vector.shape_cast %33 : vector<1x32x96xbf16> to vector<32x96xbf16>
    %cst_15 = arith.constant dense<0.000000e+00> : vector<16x96xf32>
    %35 = tpu.matmul %32, %34, %cst_15 {dimension_numbers = #tpu.dot_dimension_numbers<[1], [0], [0], [1], [0, 0, 1, 1], [], []>} : vector<16x32xbf16>, vector<32x96xbf16>, vector<16x96xf32> -> vector<16x96xf32>
    %c0_16 = arith.constant 0 : index
    %c0_17 = arith.constant 0 : index
    %c0_18 = arith.constant 0 : index
    %36 = vector.load %arg5[%c0_16, %c0_17, %c0_18] : memref<2x1x96xf32, #tpu.memory_space<vmem>>, vector<1x1x96xf32>
    %37 = vector.shape_cast %36 : vector<1x1x96xf32> to vector<1x96xf32>
    %38 = vector.broadcast %37 : vector<1x96xf32> to vector<16x96xf32>
    %39 = arith.addf %35, %38 : vector<16x96xf32>
    %40 = vector.extract_strided_slice %39 {offsets = [0, 0], sizes = [16, 16], strides = [1, 1]} : vector<16x96xf32> to vector<16x16xf32>
    %41 = vector.shape_cast %40 : vector<16x16xf32> to vector<2x8x16xf32>
    %42 = vector.extract_strided_slice %39 {offsets = [0, 16], sizes = [16, 16], strides = [1, 1]} : vector<16x96xf32> to vector<16x16xf32>
    %43 = vector.shape_cast %42 : vector<16x16xf32> to vector<2x8x16xf32>
    %44 = tpu.concatenate %41, %43 in 0 : vector<2x8x16xf32>, vector<2x8x16xf32> -> vector<4x8x16xf32>
    %45 = arith.truncf %44 : vector<4x8x16xf32> to vector<4x8x16xbf16>
    %46 = vector.extract_strided_slice %39 {offsets = [0, 32], sizes = [16, 16], strides = [1, 1]} : vector<16x96xf32> to vector<16x16xf32>
    %47 = vector.shape_cast %46 : vector<16x16xf32> to vector<2x8x16xf32>
    %48 = vector.extract_strided_slice %39 {offsets = [0, 48], sizes = [16, 16], strides = [1, 1]} : vector<16x96xf32> to vector<16x16xf32>
    %49 = vector.shape_cast %48 : vector<16x16xf32> to vector<2x8x16xf32>
    %50 = tpu.concatenate %47, %49 in 0 : vector<2x8x16xf32>, vector<2x8x16xf32> -> vector<4x8x16xf32>
    %51 = arith.truncf %50 : vector<4x8x16xf32> to vector<4x8x16xbf16>
    %52 = vector.extract_strided_slice %39 {offsets = [0, 64], sizes = [16, 16], strides = [1, 1]} : vector<16x96xf32> to vector<16x16xf32>
    %53 = vector.shape_cast %52 : vector<16x16xf32> to vector<2x8x16xf32>
    %54 = vector.extract_strided_slice %39 {offsets = [0, 80], sizes = [16, 16], strides = [1, 1]} : vector<16x96xf32> to vector<16x16xf32>
    %55 = vector.shape_cast %54 : vector<16x16xf32> to vector<2x8x16xf32>
    %56 = tpu.concatenate %53, %55 in 0 : vector<2x8x16xf32>, vector<2x8x16xf32> -> vector<4x8x16xf32>
    %57 = arith.truncf %56 : vector<4x8x16xf32> to vector<4x8x16xbf16>
    "tpu.trace_start"() <{level = 10 : i32, message = "bqd,bkd->bqk"}> : () -> ()
    %cst_19 = arith.constant dense<0.000000e+00> : vector<4x8x8xf32>
    %58 = tpu.matmul %45, %51, %cst_19 {dimension_numbers = #tpu.dot_dimension_numbers<[2], [2], [1], [1], [0, 0, 0, 1, 1, 1], [0], [0]>} : vector<4x8x16xbf16>, vector<4x8x16xbf16>, vector<4x8x8xf32> -> vector<4x8x8xf32>
    "tpu.trace_stop"() : () -> ()
    %cst_20 = arith.constant 2.500000e-01 : f32
    %59 = vector.broadcast %cst_20 : f32 to vector<4x8x8xf32>
    %60 = arith.mulf %58, %59 : vector<4x8x8xf32>
    %cst_21 = arith.constant -1.000000e+30 : f32
    %61 = vector.broadcast %cst_21 : f32 to vector<4x8x8xf32>
    %62 = arith.select %31, %60, %61 : vector<4x8x8xi1>, vector<4x8x8xf32>
    %cst_22 = arith.constant dense<0xFF800000> : vector<4x8xf32>
    %63 = vector.multi_reduction <maximumf>, %62, %cst_22 [2] : vector<4x8x8xf32> to vector<4x8xf32>
    %64 = vector.shape_cast %63 : vector<4x8xf32> to vector<4x8x1xf32>
    %65 = vector.broadcast %64 : vector<4x8x1xf32> to vector<4x8x8xf32>
    %66 = arith.subf %62, %65 : vector<4x8x8xf32>
    %67 = math.exp %66 : vector<4x8x8xf32>
    %cst_23 = arith.constant dense<0.000000e+00> : vector<4x8xf32>
    %68 = vector.multi_reduction <add>, %67, %cst_23 [2] : vector<4x8x8xf32> to vector<4x8xf32>
    %69 = vector.shape_cast %68 : vector<4x8xf32> to vector<4x8x1xf32>
    %70 = tpu.reciprocal %69 {approx = true} : vector<4x8x1xf32> -> vector<4x8x1xf32>
    %71 = vector.broadcast %70 : vector<4x8x1xf32> to vector<4x8x8xf32>
    %72 = arith.mulf %67, %71 : vector<4x8x8xf32>
    %73 = arith.truncf %72 : vector<4x8x8xf32> to vector<4x8x8xbf16>
    "tpu.trace_start"() <{level = 10 : i32, message = "bqk,bkd->bqd"}> : () -> ()
    %cst_24 = arith.constant dense<0.000000e+00> : vector<4x8x16xf32>
    %74 = tpu.matmul %73, %57, %cst_24 {dimension_numbers = #tpu.dot_dimension_numbers<[2], [1], [1], [2], [0, 0, 0, 1, 1, 2], [0], [0]>} : vector<4x8x8xbf16>, vector<4x8x16xbf16>, vector<4x8x16xf32> -> vector<4x8x16xf32>
    "tpu.trace_stop"() : () -> ()
    %75 = vector.shape_cast %74 : vector<4x8x16xf32> to vector<2x16x16xf32>
    %76 = arith.truncf %75 : vector<2x16x16xf32> to vector<2x16x16xbf16>
    %c0_25 = arith.constant 0 : index
    %c0_26 = arith.constant 0 : index
    %c0_27 = arith.constant 0 : index
    %c0_28 = arith.constant 0 : index
    %77 = vector.load %arg6[%c0_25, %c0_26, %c0_27, %c0_28] : memref<2x2x16x32xbf16, #tpu.memory_space<vmem>>, vector<1x2x16x32xbf16>
    %78 = vector.shape_cast %77 : vector<1x2x16x32xbf16> to vector<2x16x32xbf16>
    "tpu.trace_start"() <{level = 10 : i32, message = "htd,hdj->htj"}> : () -> ()
    %cst_29 = arith.constant dense<0.000000e+00> : vector<2x16x32xf32>
    %79 = tpu.matmul %76, %78, %cst_29 {dimension_numbers = #tpu.dot_dimension_numbers<[2], [1], [1], [2], [0, 0, 0, 1, 1, 2], [0], [0]>} : vector<2x16x16xbf16>, vector<2x16x32xbf16>, vector<2x16x32xf32> -> vector<2x16x32xf32>
    "tpu.trace_stop"() : () -> ()
    %cst_30 = arith.constant dense<0.000000e+00> : vector<16x32xf32>
    %80 = vector.multi_reduction <add>, %79, %cst_30 [0] : vector<2x16x32xf32> to vector<16x32xf32>
    %c0_31 = arith.constant 0 : index
    %c0_32 = arith.constant 0 : index
    %c0_33 = arith.constant 0 : index
    %81 = vector.load %arg7[%c0_31, %c0_32, %c0_33] : memref<2x1x32xf32, #tpu.memory_space<vmem>>, vector<1x1x32xf32>
    %82 = vector.shape_cast %81 : vector<1x1x32xf32> to vector<1x32xf32>
    %83 = vector.broadcast %82 : vector<1x32xf32> to vector<16x32xf32>
    %84 = arith.addf %80, %83 : vector<16x32xf32>
    %85 = arith.addf %84, %24 : vector<16x32xf32>
    %c0_34 = arith.constant 0 : index
    %c0_35 = arith.constant 0 : index
    %c0_36 = arith.constant 0 : index
    %86 = vector.load %arg8[%c0_34, %c0_35, %c0_36] : memref<2x1x32xf32, #tpu.memory_space<vmem>>, vector<1x1x32xf32>
    %87 = vector.shape_cast %86 : vector<1x1x32xf32> to vector<1x32xf32>
    %c0_37 = arith.constant 0 : index
    %c0_38 = arith.constant 0 : index
    %c0_39 = arith.constant 0 : index
    %88 = vector.load %arg9[%c0_37, %c0_38, %c0_39] : memref<2x1x32xf32, #tpu.memory_space<vmem>>, vector<1x1x32xf32>
    %89 = vector.shape_cast %88 : vector<1x1x32xf32> to vector<1x32xf32>
    %cst_40 = arith.constant dense<0.000000e+00> : vector<16xf32>
    %90 = vector.multi_reduction <add>, %85, %cst_40 [1] : vector<16x32xf32> to vector<16xf32>
    %91 = vector.shape_cast %90 : vector<16xf32> to vector<16x1xf32>
    %cst_41 = arith.constant 3.200000e+01 : f32
    %92 = vector.broadcast %cst_41 : f32 to vector<16x1xf32>
    %93 = arith.divf %91, %92 : vector<16x1xf32>
    %94 = vector.broadcast %93 : vector<16x1xf32> to vector<16x32xf32>
    %95 = arith.subf %85, %94 : vector<16x32xf32>
    %96 = arith.mulf %95, %95 : vector<16x32xf32>
    %cst_42 = arith.constant dense<0.000000e+00> : vector<16xf32>
    %97 = vector.multi_reduction <add>, %96, %cst_42 [1] : vector<16x32xf32> to vector<16xf32>
    %98 = vector.shape_cast %97 : vector<16xf32> to vector<16x1xf32>
    %cst_43 = arith.constant 3.200000e+01 : f32
    %99 = vector.broadcast %cst_43 : f32 to vector<16x1xf32>
    %100 = arith.divf %98, %99 : vector<16x1xf32>
    %101 = vector.broadcast %93 : vector<16x1xf32> to vector<16x32xf32>
    %102 = arith.subf %85, %101 : vector<16x32xf32>
    %cst_44 = arith.constant 9.99999996E-13 : f32
    %103 = vector.broadcast %cst_44 : f32 to vector<16x1xf32>
    %104 = arith.addf %100, %103 : vector<16x1xf32>
    %105 = math.rsqrt %104 : vector<16x1xf32>
    %106 = vector.broadcast %105 : vector<16x1xf32> to vector<16x32xf32>
    %107 = arith.mulf %102, %106 : vector<16x32xf32>
    %108 = vector.broadcast %87 : vector<1x32xf32> to vector<16x32xf32>
    %109 = arith.mulf %107, %108 : vector<16x32xf32>
    %110 = vector.broadcast %89 : vector<1x32xf32> to vector<16x32xf32>
    %111 = arith.addf %109, %110 : vector<16x32xf32>
    %112 = arith.truncf %111 : vector<16x32xf32> to vector<16x32xbf16>
    %c0_45 = arith.constant 0 : index
    %c0_46 = arith.constant 0 : index
    %c0_47 = arith.constant 0 : index
    %113 = vector.load %arg10[%c0_45, %c0_46, %c0_47] : memref<2x32x64xbf16, #tpu.memory_space<vmem>>, vector<1x32x64xbf16>
    %114 = vector.shape_cast %113 : vector<1x32x64xbf16> to vector<32x64xbf16>
    %cst_48 = arith.constant dense<0.000000e+00> : vector<16x64xf32>
    %115 = tpu.matmul %112, %114, %cst_48 {dimension_numbers = #tpu.dot_dimension_numbers<[1], [0], [0], [1], [0, 0, 1, 1], [], []>} : vector<16x32xbf16>, vector<32x64xbf16>, vector<16x64xf32> -> vector<16x64xf32>
    %c0_49 = arith.constant 0 : index
    %c0_50 = arith.constant 0 : index
    %c0_51 = arith.constant 0 : index
    %116 = vector.load %arg11[%c0_49, %c0_50, %c0_51] : memref<2x1x64xf32, #tpu.memory_space<vmem>>, vector<1x1x64xf32>
    %117 = vector.shape_cast %116 : vector<1x1x64xf32> to vector<1x64xf32>
    %118 = vector.broadcast %117 : vector<1x64xf32> to vector<16x64xf32>
    %119 = arith.addf %115, %118 : vector<16x64xf32>
    %120 = arith.mulf %119, %119 : vector<16x64xf32>
    %121 = arith.mulf %119, %120 : vector<16x64xf32>
    %cst_52 = arith.constant 4.471500e-02 : f32
    %122 = vector.broadcast %cst_52 : f32 to vector<16x64xf32>
    %123 = arith.mulf %122, %121 : vector<16x64xf32>
    %124 = arith.addf %119, %123 : vector<16x64xf32>
    %cst_53 = arith.constant 0.797884583 : f32
    %125 = vector.broadcast %cst_53 : f32 to vector<16x64xf32>
    %126 = arith.mulf %125, %124 : vector<16x64xf32>
    %127 = math.tanh %126 : vector<16x64xf32>
    %cst_54 = arith.constant 1.000000e+00 : f32
    %128 = vector.broadcast %cst_54 : f32 to vector<16x64xf32>
    %129 = arith.addf %128, %127 : vector<16x64xf32>
    %cst_55 = arith.constant 5.000000e-01 : f32
    %130 = vector.broadcast %cst_55 : f32 to vector<16x64xf32>
    %131 = arith.mulf %130, %129 : vector<16x64xf32>
    %132 = arith.mulf %119, %131 : vector<16x64xf32>
    %133 = arith.truncf %132 : vector<16x64xf32> to vector<16x64xbf16>
    %c0_56 = arith.constant 0 : index
    %c0_57 = arith.constant 0 : index
    %c0_58 = arith.constant 0 : index
    %134 = vector.load %arg12[%c0_56, %c0_57, %c0_58] : memref<2x64x32xbf16, #tpu.memory_space<vmem>>, vector<1x64x32xbf16>
    %135 = vector.shape_cast %134 : vector<1x64x32xbf16> to vector<64x32xbf16>
    %cst_59 = arith.constant dense<0.000000e+00> : vector<16x32xf32>
    %136 = tpu.matmul %133, %135, %cst_59 {dimension_numbers = #tpu.dot_dimension_numbers<[1], [0], [0], [1], [0, 0, 1, 1], [], []>} : vector<16x64xbf16>, vector<64x32xbf16>, vector<16x32xf32> -> vector<16x32xf32>
    %c0_60 = arith.constant 0 : index
    %c0_61 = arith.constant 0 : index
    %c0_62 = arith.constant 0 : index
    %137 = vector.load %arg13[%c0_60, %c0_61, %c0_62] : memref<2x1x32xf32, #tpu.memory_space<vmem>>, vector<1x1x32xf32>
    %138 = vector.shape_cast %137 : vector<1x1x32xf32> to vector<1x32xf32>
    %139 = vector.broadcast %138 : vector<1x32xf32> to vector<16x32xf32>
    %140 = arith.addf %136, %139 : vector<16x32xf32>
    %141 = arith.addf %140, %111 : vector<16x32xf32>
    %c0_63 = arith.constant 0 : index
    %c0_64 = arith.constant 0 : index
    %c0_65 = arith.constant 0 : index
    %142 = vector.load %arg14[%c0_63, %c0_64, %c0_65] : memref<2x1x32xf32, #tpu.memory_space<vmem>>, vector<1x1x32xf32>
    %143 = vector.shape_cast %142 : vector<1x1x32xf32> to vector<1x32xf32>
    %c0_66 = arith.constant 0 : index
    %c0_67 = arith.constant 0 : index
    %c0_68 = arith.constant 0 : index
    %144 = vector.load %arg15[%c0_66, %c0_67, %c0_68] : memref<2x1x32xf32, #tpu.memory_space<vmem>>, vector<1x1x32xf32>
    %145 = vector.shape_cast %144 : vector<1x1x32xf32> to vector<1x32xf32>
    %cst_69 = arith.constant dense<0.000000e+00> : vector<16xf32>
    %146 = vector.multi_reduction <add>, %141, %cst_69 [1] : vector<16x32xf32> to vector<16xf32>
    %147 = vector.shape_cast %146 : vector<16xf32> to vector<16x1xf32>
    %cst_70 = arith.constant 3.200000e+01 : f32
    %148 = vector.broadcast %cst_70 : f32 to vector<16x1xf32>
    %149 = arith.divf %147, %148 : vector<16x1xf32>
    %150 = vector.broadcast %149 : vector<16x1xf32> to vector<16x32xf32>
    %151 = arith.subf %141, %150 : vector<16x32xf32>
    %152 = arith.mulf %151, %151 : vector<16x32xf32>
    %cst_71 = arith.constant dense<0.000000e+00> : vector<16xf32>
    %153 = vector.multi_reduction <add>, %152, %cst_71 [1] : vector<16x32xf32> to vector<16xf32>
    %154 = vector.shape_cast %153 : vector<16xf32> to vector<16x1xf32>
    %cst_72 = arith.constant 3.200000e+01 : f32
    %155 = vector.broadcast %cst_72 : f32 to vector<16x1xf32>
    %156 = arith.divf %154, %155 : vector<16x1xf32>
    %157 = vector.broadcast %149 : vector<16x1xf32> to vector<16x32xf32>
    %158 = arith.subf %141, %157 : vector<16x32xf32>
    %cst_73 = arith.constant 9.99999996E-13 : f32
    %159 = vector.broadcast %cst_73 : f32 to vector<16x1xf32>
    %160 = arith.addf %156, %159 : vector<16x1xf32>
    %161 = math.rsqrt %160 : vector<16x1xf32>
    %162 = vector.broadcast %161 : vector<16x1xf32> to vector<16x32xf32>
    %163 = arith.mulf %158, %162 : vector<16x32xf32>
    %164 = vector.broadcast %143 : vector<1x32xf32> to vector<16x32xf32>
    %165 = arith.mulf %163, %164 : vector<16x32xf32>
    %166 = vector.broadcast %145 : vector<1x32xf32> to vector<16x32xf32>
    %167 = arith.addf %165, %166 : vector<16x32xf32>
    %168 = arith.truncf %167 : vector<16x32xf32> to vector<16x32xbf16>
    %c1 = arith.constant 1 : index
    %c0_74 = arith.constant 0 : index
    %c0_75 = arith.constant 0 : index
    %169 = vector.load %arg4[%c1, %c0_74, %c0_75] : memref<2x32x96xbf16, #tpu.memory_space<vmem>>, vector<1x32x96xbf16>
    %170 = vector.shape_cast %169 : vector<1x32x96xbf16> to vector<32x96xbf16>
    %cst_76 = arith.constant dense<0.000000e+00> : vector<16x96xf32>
    %171 = tpu.matmul %168, %170, %cst_76 {dimension_numbers = #tpu.dot_dimension_numbers<[1], [0], [0], [1], [0, 0, 1, 1], [], []>} : vector<16x32xbf16>, vector<32x96xbf16>, vector<16x96xf32> -> vector<16x96xf32>
    %c1_77 = arith.constant 1 : index
    %c0_78 = arith.constant 0 : index
    %c0_79 = arith.constant 0 : index
    %172 = vector.load %arg5[%c1_77, %c0_78, %c0_79] : memref<2x1x96xf32, #tpu.memory_space<vmem>>, vector<1x1x96xf32>
    %173 = vector.shape_cast %172 : vector<1x1x96xf32> to vector<1x96xf32>
    %174 = vector.broadcast %173 : vector<1x96xf32> to vector<16x96xf32>
    %175 = arith.addf %171, %174 : vector<16x96xf32>
    %176 = vector.extract_strided_slice %175 {offsets = [0, 0], sizes = [16, 16], strides = [1, 1]} : vector<16x96xf32> to vector<16x16xf32>
    %177 = vector.shape_cast %176 : vector<16x16xf32> to vector<2x8x16xf32>
    %178 = vector.extract_strided_slice %175 {offsets = [0, 16], sizes = [16, 16], strides = [1, 1]} : vector<16x96xf32> to vector<16x16xf32>
    %179 = vector.shape_cast %178 : vector<16x16xf32> to vector<2x8x16xf32>
    %180 = tpu.concatenate %177, %179 in 0 : vector<2x8x16xf32>, vector<2x8x16xf32> -> vector<4x8x16xf32>
    %181 = arith.truncf %180 : vector<4x8x16xf32> to vector<4x8x16xbf16>
    %182 = vector.extract_strided_slice %175 {offsets = [0, 32], sizes = [16, 16], strides = [1, 1]} : vector<16x96xf32> to vector<16x16xf32>
    %183 = vector.shape_cast %182 : vector<16x16xf32> to vector<2x8x16xf32>
    %184 = vector.extract_strided_slice %175 {offsets = [0, 48], sizes = [16, 16], strides = [1, 1]} : vector<16x96xf32> to vector<16x16xf32>
    %185 = vector.shape_cast %184 : vector<16x16xf32> to vector<2x8x16xf32>
    %186 = tpu.concatenate %183, %185 in 0 : vector<2x8x16xf32>, vector<2x8x16xf32> -> vector<4x8x16xf32>
    %187 = arith.truncf %186 : vector<4x8x16xf32> to vector<4x8x16xbf16>
    %188 = vector.extract_strided_slice %175 {offsets = [0, 64], sizes = [16, 16], strides = [1, 1]} : vector<16x96xf32> to vector<16x16xf32>
    %189 = vector.shape_cast %188 : vector<16x16xf32> to vector<2x8x16xf32>
    %190 = vector.extract_strided_slice %175 {offsets = [0, 80], sizes = [16, 16], strides = [1, 1]} : vector<16x96xf32> to vector<16x16xf32>
    %191 = vector.shape_cast %190 : vector<16x16xf32> to vector<2x8x16xf32>
    %192 = tpu.concatenate %189, %191 in 0 : vector<2x8x16xf32>, vector<2x8x16xf32> -> vector<4x8x16xf32>
    %193 = arith.truncf %192 : vector<4x8x16xf32> to vector<4x8x16xbf16>
    "tpu.trace_start"() <{level = 10 : i32, message = "bqd,bkd->bqk"}> : () -> ()
    %cst_80 = arith.constant dense<0.000000e+00> : vector<4x8x8xf32>
    %194 = tpu.matmul %181, %187, %cst_80 {dimension_numbers = #tpu.dot_dimension_numbers<[2], [2], [1], [1], [0, 0, 0, 1, 1, 1], [0], [0]>} : vector<4x8x16xbf16>, vector<4x8x16xbf16>, vector<4x8x8xf32> -> vector<4x8x8xf32>
    "tpu.trace_stop"() : () -> ()
    %cst_81 = arith.constant 2.500000e-01 : f32
    %195 = vector.broadcast %cst_81 : f32 to vector<4x8x8xf32>
    %196 = arith.mulf %194, %195 : vector<4x8x8xf32>
    %cst_82 = arith.constant -1.000000e+30 : f32
    %197 = vector.broadcast %cst_82 : f32 to vector<4x8x8xf32>
    %198 = arith.select %31, %196, %197 : vector<4x8x8xi1>, vector<4x8x8xf32>
    %cst_83 = arith.constant dense<0xFF800000> : vector<4x8xf32>
    %199 = vector.multi_reduction <maximumf>, %198, %cst_83 [2] : vector<4x8x8xf32> to vector<4x8xf32>
    %200 = vector.shape_cast %199 : vector<4x8xf32> to vector<4x8x1xf32>
    %201 = vector.broadcast %200 : vector<4x8x1xf32> to vector<4x8x8xf32>
    %202 = arith.subf %198, %201 : vector<4x8x8xf32>
    %203 = math.exp %202 : vector<4x8x8xf32>
    %cst_84 = arith.constant dense<0.000000e+00> : vector<4x8xf32>
    %204 = vector.multi_reduction <add>, %203, %cst_84 [2] : vector<4x8x8xf32> to vector<4x8xf32>
    %205 = vector.shape_cast %204 : vector<4x8xf32> to vector<4x8x1xf32>
    %206 = tpu.reciprocal %205 {approx = true} : vector<4x8x1xf32> -> vector<4x8x1xf32>
    %207 = vector.broadcast %206 : vector<4x8x1xf32> to vector<4x8x8xf32>
    %208 = arith.mulf %203, %207 : vector<4x8x8xf32>
    %209 = arith.truncf %208 : vector<4x8x8xf32> to vector<4x8x8xbf16>
    "tpu.trace_start"() <{level = 10 : i32, message = "bqk,bkd->bqd"}> : () -> ()
    %cst_85 = arith.constant dense<0.000000e+00> : vector<4x8x16xf32>
    %210 = tpu.matmul %209, %193, %cst_85 {dimension_numbers = #tpu.dot_dimension_numbers<[2], [1], [1], [2], [0, 0, 0, 1, 1, 2], [0], [0]>} : vector<4x8x8xbf16>, vector<4x8x16xbf16>, vector<4x8x16xf32> -> vector<4x8x16xf32>
    "tpu.trace_stop"() : () -> ()
    %211 = vector.shape_cast %210 : vector<4x8x16xf32> to vector<2x16x16xf32>
    %212 = arith.truncf %211 : vector<2x16x16xf32> to vector<2x16x16xbf16>
    %c1_86 = arith.constant 1 : index
    %c0_87 = arith.constant 0 : index
    %c0_88 = arith.constant 0 : index
    %c0_89 = arith.constant 0 : index
    %213 = vector.load %arg6[%c1_86, %c0_87, %c0_88, %c0_89] : memref<2x2x16x32xbf16, #tpu.memory_space<vmem>>, vector<1x2x16x32xbf16>
    %214 = vector.shape_cast %213 : vector<1x2x16x32xbf16> to vector<2x16x32xbf16>
    "tpu.trace_start"() <{level = 10 : i32, message = "htd,hdj->htj"}> : () -> ()
    %cst_90 = arith.constant dense<0.000000e+00> : vector<2x16x32xf32>
    %215 = tpu.matmul %212, %214, %cst_90 {dimension_numbers = #tpu.dot_dimension_numbers<[2], [1], [1], [2], [0, 0, 0, 1, 1, 2], [0], [0]>} : vector<2x16x16xbf16>, vector<2x16x32xbf16>, vector<2x16x32xf32> -> vector<2x16x32xf32>
    "tpu.trace_stop"() : () -> ()
    %cst_91 = arith.constant dense<0.000000e+00> : vector<16x32xf32>
    %216 = vector.multi_reduction <add>, %215, %cst_91 [0] : vector<2x16x32xf32> to vector<16x32xf32>
    %c1_92 = arith.constant 1 : index
    %c0_93 = arith.constant 0 : index
    %c0_94 = arith.constant 0 : index
    %217 = vector.load %arg7[%c1_92, %c0_93, %c0_94] : memref<2x1x32xf32, #tpu.memory_space<vmem>>, vector<1x1x32xf32>
    %218 = vector.shape_cast %217 : vector<1x1x32xf32> to vector<1x32xf32>
    %219 = vector.broadcast %218 : vector<1x32xf32> to vector<16x32xf32>
    %220 = arith.addf %216, %219 : vector<16x32xf32>
    %221 = arith.addf %220, %167 : vector<16x32xf32>
    %c1_95 = arith.constant 1 : index
    %c0_96 = arith.constant 0 : index
    %c0_97 = arith.constant 0 : index
    %222 = vector.load %arg8[%c1_95, %c0_96, %c0_97] : memref<2x1x32xf32, #tpu.memory_space<vmem>>, vector<1x1x32xf32>
    %223 = vector.shape_cast %222 : vector<1x1x32xf32> to vector<1x32xf32>
    %c1_98 = arith.constant 1 : index
    %c0_99 = arith.constant 0 : index
    %c0_100 = arith.constant 0 : index
    %224 = vector.load %arg9[%c1_98, %c0_99, %c0_100] : memref<2x1x32xf32, #tpu.memory_space<vmem>>, vector<1x1x32xf32>
    %225 = vector.shape_cast %224 : vector<1x1x32xf32> to vector<1x32xf32>
    %cst_101 = arith.constant dense<0.000000e+00> : vector<16xf32>
    %226 = vector.multi_reduction <add>, %221, %cst_101 [1] : vector<16x32xf32> to vector<16xf32>
    %227 = vector.shape_cast %226 : vector<16xf32> to vector<16x1xf32>
    %cst_102 = arith.constant 3.200000e+01 : f32
    %228 = vector.broadcast %cst_102 : f32 to vector<16x1xf32>
    %229 = arith.divf %227, %228 : vector<16x1xf32>
    %230 = vector.broadcast %229 : vector<16x1xf32> to vector<16x32xf32>
    %231 = arith.subf %221, %230 : vector<16x32xf32>
    %232 = arith.mulf %231, %231 : vector<16x32xf32>
    %cst_103 = arith.constant dense<0.000000e+00> : vector<16xf32>
    %233 = vector.multi_reduction <add>, %232, %cst_103 [1] : vector<16x32xf32> to vector<16xf32>
    %234 = vector.shape_cast %233 : vector<16xf32> to vector<16x1xf32>
    %cst_104 = arith.constant 3.200000e+01 : f32
    %235 = vector.broadcast %cst_104 : f32 to vector<16x1xf32>
    %236 = arith.divf %234, %235 : vector<16x1xf32>
    %237 = vector.broadcast %229 : vector<16x1xf32> to vector<16x32xf32>
    %238 = arith.subf %221, %237 : vector<16x32xf32>
    %cst_105 = arith.constant 9.99999996E-13 : f32
    %239 = vector.broadcast %cst_105 : f32 to vector<16x1xf32>
    %240 = arith.addf %236, %239 : vector<16x1xf32>
    %241 = math.rsqrt %240 : vector<16x1xf32>
    %242 = vector.broadcast %241 : vector<16x1xf32> to vector<16x32xf32>
    %243 = arith.mulf %238, %242 : vector<16x32xf32>
    %244 = vector.broadcast %223 : vector<1x32xf32> to vector<16x32xf32>
    %245 = arith.mulf %243, %244 : vector<16x32xf32>
    %246 = vector.broadcast %225 : vector<1x32xf32> to vector<16x32xf32>
    %247 = arith.addf %245, %246 : vector<16x32xf32>
    %248 = arith.truncf %247 : vector<16x32xf32> to vector<16x32xbf16>
    %c1_106 = arith.constant 1 : index
    %c0_107 = arith.constant 0 : index
    %c0_108 = arith.constant 0 : index
    %249 = vector.load %arg10[%c1_106, %c0_107, %c0_108] : memref<2x32x64xbf16, #tpu.memory_space<vmem>>, vector<1x32x64xbf16>
    %250 = vector.shape_cast %249 : vector<1x32x64xbf16> to vector<32x64xbf16>
    %cst_109 = arith.constant dense<0.000000e+00> : vector<16x64xf32>
    %251 = tpu.matmul %248, %250, %cst_109 {dimension_numbers = #tpu.dot_dimension_numbers<[1], [0], [0], [1], [0, 0, 1, 1], [], []>} : vector<16x32xbf16>, vector<32x64xbf16>, vector<16x64xf32> -> vector<16x64xf32>
    %c1_110 = arith.constant 1 : index
    %c0_111 = arith.constant 0 : index
    %c0_112 = arith.constant 0 : index
    %252 = vector.load %arg11[%c1_110, %c0_111, %c0_112] : memref<2x1x64xf32, #tpu.memory_space<vmem>>, vector<1x1x64xf32>
    %253 = vector.shape_cast %252 : vector<1x1x64xf32> to vector<1x64xf32>
    %254 = vector.broadcast %253 : vector<1x64xf32> to vector<16x64xf32>
    %255 = arith.addf %251, %254 : vector<16x64xf32>
    %256 = arith.mulf %255, %255 : vector<16x64xf32>
    %257 = arith.mulf %255, %256 : vector<16x64xf32>
    %cst_113 = arith.constant 4.471500e-02 : f32
    %258 = vector.broadcast %cst_113 : f32 to vector<16x64xf32>
    %259 = arith.mulf %258, %257 : vector<16x64xf32>
    %260 = arith.addf %255, %259 : vector<16x64xf32>
    %cst_114 = arith.constant 0.797884583 : f32
    %261 = vector.broadcast %cst_114 : f32 to vector<16x64xf32>
    %262 = arith.mulf %261, %260 : vector<16x64xf32>
    %263 = math.tanh %262 : vector<16x64xf32>
    %cst_115 = arith.constant 1.000000e+00 : f32
    %264 = vector.broadcast %cst_115 : f32 to vector<16x64xf32>
    %265 = arith.addf %264, %263 : vector<16x64xf32>
    %cst_116 = arith.constant 5.000000e-01 : f32
    %266 = vector.broadcast %cst_116 : f32 to vector<16x64xf32>
    %267 = arith.mulf %266, %265 : vector<16x64xf32>
    %268 = arith.mulf %255, %267 : vector<16x64xf32>
    %269 = arith.truncf %268 : vector<16x64xf32> to vector<16x64xbf16>
    %c1_117 = arith.constant 1 : index
    %c0_118 = arith.constant 0 : index
    %c0_119 = arith.constant 0 : index
    %270 = vector.load %arg12[%c1_117, %c0_118, %c0_119] : memref<2x64x32xbf16, #tpu.memory_space<vmem>>, vector<1x64x32xbf16>
    %271 = vector.shape_cast %270 : vector<1x64x32xbf16> to vector<64x32xbf16>
    %cst_120 = arith.constant dense<0.000000e+00> : vector<16x32xf32>
    %272 = tpu.matmul %269, %271, %cst_120 {dimension_numbers = #tpu.dot_dimension_numbers<[1], [0], [0], [1], [0, 0, 1, 1], [], []>} : vector<16x64xbf16>, vector<64x32xbf16>, vector<16x32xf32> -> vector<16x32xf32>
    %c1_121 = arith.constant 1 : index
    %c0_122 = arith.constant 0 : index
    %c0_123 = arith.constant 0 : index
    %273 = vector.load %arg13[%c1_121, %c0_122, %c0_123] : memref<2x1x32xf32, #tpu.memory_space<vmem>>, vector<1x1x32xf32>
    %274 = vector.shape_cast %273 : vector<1x1x32xf32> to vector<1x32xf32>
    %275 = vector.broadcast %274 : vector<1x32xf32> to vector<16x32xf32>
    %276 = arith.addf %272, %275 : vector<16x32xf32>
    %277 = arith.addf %276, %247 : vector<16x32xf32>
    %c1_124 = arith.constant 1 : index
    %c0_125 = arith.constant 0 : index
    %c0_126 = arith.constant 0 : index
    %278 = vector.load %arg14[%c1_124, %c0_125, %c0_126] : memref<2x1x32xf32, #tpu.memory_space<vmem>>, vector<1x1x32xf32>
    %279 = vector.shape_cast %278 : vector<1x1x32xf32> to vector<1x32xf32>
    %c1_127 = arith.constant 1 : index
    %c0_128 = arith.constant 0 : index
    %c0_129 = arith.constant 0 : index
    %280 = vector.load %arg15[%c1_127, %c0_128, %c0_129] : memref<2x1x32xf32, #tpu.memory_space<vmem>>, vector<1x1x32xf32>
    %281 = vector.shape_cast %280 : vector<1x1x32xf32> to vector<1x32xf32>
    %cst_130 = arith.constant dense<0.000000e+00> : vector<16xf32>
    %282 = vector.multi_reduction <add>, %277, %cst_130 [1] : vector<16x32xf32> to vector<16xf32>
    %283 = vector.shape_cast %282 : vector<16xf32> to vector<16x1xf32>
    %cst_131 = arith.constant 3.200000e+01 : f32
    %284 = vector.broadcast %cst_131 : f32 to vector<16x1xf32>
    %285 = arith.divf %283, %284 : vector<16x1xf32>
    %286 = vector.broadcast %285 : vector<16x1xf32> to vector<16x32xf32>
    %287 = arith.subf %277, %286 : vector<16x32xf32>
    %288 = arith.mulf %287, %287 : vector<16x32xf32>
    %cst_132 = arith.constant dense<0.000000e+00> : vector<16xf32>
    %289 = vector.multi_reduction <add>, %288, %cst_132 [1] : vector<16x32xf32> to vector<16xf32>
    %290 = vector.shape_cast %289 : vector<16xf32> to vector<16x1xf32>
    %cst_133 = arith.constant 3.200000e+01 : f32
    %291 = vector.broadcast %cst_133 : f32 to vector<16x1xf32>
    %292 = arith.divf %290, %291 : vector<16x1xf32>
    %293 = vector.broadcast %285 : vector<16x1xf32> to vector<16x32xf32>
    %294 = arith.subf %277, %293 : vector<16x32xf32>
    %cst_134 = arith.constant 9.99999996E-13 : f32
    %295 = vector.broadcast %cst_134 : f32 to vector<16x1xf32>
    %296 = arith.addf %292, %295 : vector<16x1xf32>
    %297 = math.rsqrt %296 : vector<16x1xf32>
    %298 = vector.broadcast %297 : vector<16x1xf32> to vector<16x32xf32>
    %299 = arith.mulf %294, %298 : vector<16x32xf32>
    %300 = vector.broadcast %279 : vector<1x32xf32> to vector<16x32xf32>
    %301 = arith.mulf %299, %300 : vector<16x32xf32>
    %302 = vector.broadcast %281 : vector<1x32xf32> to vector<16x32xf32>
    %303 = arith.addf %301, %302 : vector<16x32xf32>
    %c0_135 = arith.constant 0 : index
    %c0_136 = arith.constant 0 : index
    %304 = vector.load %arg19[%c0_135, %c0_136] : memref<16x32xf32, #tpu.memory_space<vmem>>, vector<16x32xf32>
    tpu.vector_store %arg19[%c0_135, %c0_136], %303 {strides = array<i32>} : memref<16x32xf32, #tpu.memory_space<vmem>>, vector<16x32xf32>,
    %305 = vector.shape_cast %303 : vector<16x32xf32> to vector<2x8x32xf32>
    %306 = vector.extract_strided_slice %305 {offsets = [0, 0, 0], sizes = [2, 1, 32], strides = [1, 1, 1]} : vector<2x8x32xf32> to vector<2x1x32xf32>
    %307 = vector.shape_cast %306 : vector<2x1x32xf32> to vector<2x32xf32>
    %308 = arith.truncf %307 : vector<2x32xf32> to vector<2x32xbf16>
    %c0_137 = arith.constant 0 : index
    %c0_138 = arith.constant 0 : index
    %309 = vector.load %arg16[%c0_137, %c0_138] : memref<32x128xbf16, #tpu.memory_space<vmem>>, vector<32x128xbf16>
    %cst_139 = arith.constant dense<0.000000e+00> : vector<2x128xf32>
    %310 = tpu.matmul %308, %309, %cst_139 {dimension_numbers = #tpu.dot_dimension_numbers<[1], [0], [0], [1], [0, 0, 1, 1], [], []>} : vector<2x32xbf16>, vector<32x128xbf16>, vector<2x128xf32> -> vector<2x128xf32>
    %c0_140 = arith.constant 0 : index
    %c0_141 = arith.constant 0 : index
    %311 = vector.load %arg17[%c0_140, %c0_141] : memref<1x128xf32, #tpu.memory_space<vmem>>, vector<1x128xf32>
    %312 = vector.broadcast %311 : vector<1x128xf32> to vector<2x128xf32>
    %313 = arith.addf %310, %312 : vector<2x128xf32>
    %c0_142 = arith.constant 0 : index
    %c0_143 = arith.constant 0 : index
    %314 = vector.load %arg20[%c0_142, %c0_143] : memref<2x128xf32, #tpu.memory_space<vmem>>, vector<2x128xf32>
    tpu.vector_store %arg20[%c0_142, %c0_143], %313 {strides = array<i32>} : memref<2x128xf32, #tpu.memory_space<vmem>>, vector<2x128xf32>,
    %315 = tpu.iota {dimensions = array<i32: 1>} : vector<1x128xi32>
    %c3_i32 = arith.constant 3 : i32
    %316 = vector.broadcast %c3_i32 : i32 to vector<1x128xi32>
    %317 = arith.cmpi slt, %315, %316 : vector<1x128xi32>
    %cst_144 = arith.constant -1.000000e+30 : f32
    %318 = vector.shape_cast %317 : vector<1x128xi1> to vector<1x128xi1>
    %319 = vector.broadcast %318 : vector<1x128xi1> to vector<2x128xi1>
    %320 = vector.broadcast %cst_144 : f32 to vector<2x128xf32>
    %321 = arith.select %319, %313, %320 : vector<2x128xi1>, vector<2x128xf32>
    %cst_145 = arith.constant dense<0xFF800000> : vector<2xf32>
    %322 = vector.multi_reduction <maximumf>, %321, %cst_145 [1] : vector<2x128xf32> to vector<2xf32>
    %323 = vector.shape_cast %322 : vector<2xf32> to vector<2x1xf32>
    %324 = vector.broadcast %323 : vector<2x1xf32> to vector<2x128xf32>
    %325 = arith.subf %321, %324 : vector<2x128xf32>
    %326 = math.exp %325 : vector<2x128xf32>
    %cst_146 = arith.constant dense<0.000000e+00> : vector<2xf32>
    %327 = vector.multi_reduction <add>, %326, %cst_146 [1] : vector<2x128xf32> to vector<2xf32>
    %328 = vector.shape_cast %327 : vector<2xf32> to vector<2x1xf32>
    %329 = math.log %328 : vector<2x1xf32>
    %330 = arith.addf %329, %323 : vector<2x1xf32>
    %c0_147 = arith.constant 0 : index
    %c0_148 = arith.constant 0 : index
    %331 = vector.load %arg18[%c0_147, %c0_148] : memref<2x128xf32, #tpu.memory_space<vmem>>, vector<2x128xf32>
    %332 = arith.mulf %331, %313 : vector<2x128xf32>
    %cst_149 = arith.constant dense<0.000000e+00> : vector<2xf32>
    %333 = vector.multi_reduction <add>, %332, %cst_149 [1] : vector<2x128xf32> to vector<2xf32>
    %334 = vector.shape_cast %333 : vector<2xf32> to vector<2x1xf32>
    %335 = arith.subf %330, %334 : vector<2x1xf32>
    %336 = vector.shape_cast %335 : vector<2x1xf32> to vector<1x2x1xf32>
    %cst_150 = arith.constant dense<0.000000e+00> : vector<1xf32>
    %337 = vector.multi_reduction <add>, %336, %cst_150 [1, 2] : vector<1x2x1xf32> to vector<1xf32>
    %338 = vector.shape_cast %337 : vector<1xf32> to vector<1x1x1xf32>
    %339 = vector.extract %338[0, 0, 0] : f32 from vector<1x1x1xf32>
    %340 = vector.broadcast %339 : f32 to vector<1x1xf32>
    %cst_151 = arith.constant 2.000000e+00 : f32
    %341 = vector.broadcast %cst_151 : f32 to vector<1x1xf32>
    %342 = arith.divf %340, %341 : vector<1x1xf32>
    %c0_152 = arith.constant 0 : index
    %c0_153 = arith.constant 0 : index
    %343 = vector.load %arg21[%c0_152, %c0_153] : memref<1x1xf32, #tpu.memory_space<vmem>>, vector<1x1xf32>
    tpu.vector_store %arg21[%c0_152, %c0_153], %342 {strides = array<i32>} : memref<1x1xf32, #tpu.memory_space<vmem>>, vector<1x1xf32>,
    return
  }
}

</mosaic_0001>

<bundles_post_ra>
// kernel: tpu_custom_call.1
= control target key start
LH: loop header
LB: loop body
LE: loop exit
PB: predicated region body
PF: predicated region fallthrough
CT: control target
= control target key end

     0   :  { %s3534_s0 = inlined_call_operand.hbm [shape: f32[16,32], index: 0, kind: input, shape index: {}]   ;;  %s3535_s1 = inlined_call_operand.hbm [shape: f32[2,8], index: 1, kind: input, shape index: {}]   ;;  %s3536_s2 = inlined_call_operand.hbm [shape: f32[1,32], index: 2, kind: input, shape index: {}]   ;;  %s3537_s3 = inlined_call_operand.hbm [shape: f32[1,32], index: 3, kind: input, shape index: {}]   ;;  %s3538_s4 = inlined_call_operand.vmem [shape: bf16[2,32,96], index: 4, kind: input, shape index: {}]   ;;  %s3539_s5 = inlined_call_operand.hbm [shape: f32[2,1,96], index: 5, kind: input, shape index: {}]   ;;  %s3540_s6 = inlined_call_operand.vmem [shape: bf16[2,2,16,32], index: 6, kind: input, shape index: {}]   ;;  %s3541_s7 = inlined_call_operand.hbm [shape: f32[2,1,32], index: 7, kind: input, shape index: {}]   ;;  %s3542_s8 = inlined_call_operand.hbm [shape: f32[2,1,32], index: 8, kind: input, shape index: {}]   ;;  %s3543_s9 = inlined_call_operand.hbm [shape: f32[2,1,32], index: 9, kind: input, shape index: {}]   ;;  %s3544_s10 = inlined_call_operand.vmem [shape: bf16[2,32,64], index: 10, kind: input, shape index: {}]   ;;  %s3545_s11 = inlined_call_operand.vmem [shape: f32[2,1,64], index: 11, kind: input, shape index: {}]   ;;  %s3546_s12 = inlined_call_operand.vmem [shape: bf16[2,64,32], index: 12, kind: input, shape index: {}]   ;;  %s3547_s13 = inlined_call_operand.vmem [shape: f32[2,1,32], index: 13, kind: input, shape index: {}]   ;;  %s3548_s14 = inlined_call_operand.vmem [shape: f32[2,1,32], index: 14, kind: input, shape index: {}]   ;;  %s3549_s15 = inlined_call_operand.vmem [shape: f32[2,1,32], index: 15, kind: input, shape index: {}]   ;;  %s3550_s16 = inlined_call_operand.vmem [shape: bf16[32,128], index: 16, kind: input, shape index: {}]   ;;  %s3551_s17 = inlined_call_operand.vmem [shape: f32[1,128], index: 17, kind: input, shape index: {}]   ;;  %s3552_s18 = inlined_call_operand.vmem [shape: f32[2,128], index: 18, kind: input, shape index: {}]   ;;  %s3553_s19 = inlined_call_operand.hbm [shape: f32[16,32], index: 19, kind: output, shape index: {0}]   ;;  %s3554_s20 = inlined_call_operand.hbm [shape: f32[2,128], index: 20, kind: output, shape index: {1}]   ;;  %s3555_s21 = inlined_call_operand.hbm [shape: f32[1,1], index: 21, kind: output, shape index: {2}]  }
   0x1   :  { %3560 = sst [smem:[#allocation27_spill]] %s3534_s0 }
   0x2   :  { %3561 = sst [smem:[#allocation28_spill]] %s3535_s1 }
   0x3   :  { %3562 = sst [smem:[#allocation29_spill]] %s3536_s2 }
   0x4   :  { %3563 = sst [smem:[#allocation30_spill]] %s3537_s3 }
   0x5   :  { %3564 = sst [smem:[#allocation31_spill]] %s3538_s4 }
   0x6   :  { %3565 = sst [smem:[#allocation32_spill]] %s3539_s5 }
   0x7   :  { %27 = vsyncpa [#allocation3], 0 }
   0x8   :  { %28 = vsyncpa [#allocation6], 0 }
   0x9   :  { %29 = vsyncpa [#allocation9], 0 }
   0xa   :  { %30 = vsyncpa [#allocation12], 0 }
   0xb   :  { %31 = vsyncpa [#allocation15], 0 }
   0xc   :  { %32 = vsyncpa [#allocation4], 0 }
   0xd   :  { %33 = vsyncpa [#allocation18], 0  ;;  %s2965_s2 = smov [#allocation5]   ;;  %s2966_s26 = smov [#allocation8]  }
   0xe   :  { %s52_s25 = sshll.u32 %s2965_s2, 4  ;;  %s72_s27 = sshll.u32 %s2966_s26, 4  ;;  %s53_s25 = int_to_ptr.vmem [resolvable:$true] %s52_s25  ;;  %s73_s27 = int_to_ptr.vmem [resolvable:$true] %s72_s27 }
   0xf   :  { %s2739_s3 = scalar_lea.vmem %s53_s25, 32  ;;  %p2744_p1 = scmp.lt.s32.totalorder %s53_s25, %s53_s25 }
  0x10   :  { %p2740_p0 = scmp.ne.s32.totalorder %s53_s25, %s2739_s3  ;;  %p2745_p2 = scmp.lt.s32.totalorder %s2739_s3, %s2739_s3 }
  0x12   :  { %p2746_p3 = por %p2745_p2, %p2744_p1 }
  0x14   :  { %p2747_p4 = pnand %p2746_p3, %p2740_p0 }
  0x16   :  { %2750 = shalt.err (!%p2747_p4)
}
  0x17   :  { %s3566_s0 = sld [smem:[#allocation28_spill]]  ;;  %s2759_s4 = scalar_lea.vmem %s73_s27, 16 }
  0x18   :  { %p2760_p5 = scmp.ne.s32.totalorder %s73_s27, %s2759_s4  ;;  %s2763_s30 = scalar_lea.vmem %s73_s27, 32 }
  0x19   :  { %p2764_p6 = scmp.lt.s32.totalorder %s73_s27, %s73_s27  ;;  %p2765_p7 = scmp.lt.s32.totalorder %s2763_s30, %s2759_s4 }
  0x1b   :  { %p2766_p8 = por %p2765_p7, %p2764_p6 }
  0x1d   :  { %55 = dma.hbm_to_vmem [thread:$0]  %s3566_s0, 32, %s53_s25, [#allocation6]  }
  0x1e   :  { %p2767_p9 = pnand %p2766_p8, %p2760_p5 }
  0x20   :  { %2770 = shalt.err (!%p2767_p9)
}
  0x21   :  { %s3567_s23 = sld [smem:[#allocation30_spill]]  ;;  %s2967_s1 = smov [#allocation11]  }
  0x22   :  { %s97_s24 = sshll.u32 %s2967_s1, 4  ;;  %s2968_s2 = smov [#allocation2]   ;;  %s98_s24 = int_to_ptr.vmem [resolvable:$true] %s97_s24 }
  0x23   :  { %s39_s26 = sshll.u32 %s2968_s2, 4  ;;  %s2779_s3 = scalar_lea.vmem %s98_s24, 32  ;;  %s40_s26 = int_to_ptr.vmem [resolvable:$true] %s39_s26 }
  0x24   :  { %p2780_p10 = scmp.ne.s32.totalorder %s98_s24, %s2779_s3  ;;  %p2784_p11 = scmp.lt.s32.totalorder %s98_s24, %s98_s24 }
  0x25   :  { %p2785_p12 = scmp.lt.s32.totalorder %s2779_s3, %s2779_s3 }
  0x27   :  { %75 = dma.hbm_to_vmem [thread:$0]  %s3567_s23, 16, %s73_s27, [#allocation9]  }
  0x28   :  { %p2786_p13 = por %p2785_p12, %p2784_p11 }
  0x2a   :  { %p2787_p0 = pnand %p2786_p13, %p2780_p10 }
  0x2c   :  { %2790 = shalt.err (!%p2787_p0)
}
  0x2d   :  { %s3557_s25 = smov 16   ;;  %s2970_s28 = smov 1  }
  0x2e   :  { %103 = dma.hbm_to_vmem [thread:$0]  %s3541_s7, 32, %s98_s24, [#allocation12], %s3557_s25, %s3557_s25, %s2970_s28  }
  0x2f   :  { %s2799_s0 = scalar_lea.vmem %s40_s26, 256  ;;  %p2804_p2 = scmp.lt.s32.totalorder %s40_s26, %s40_s26 }
  0x30   :  { %p2800_p1 = scmp.ne.s32.totalorder %s40_s26, %s2799_s0  ;;  %p2805_p3 = scmp.lt.s32.totalorder %s2799_s0, %s2799_s0 }
  0x32   :  { %p2806_p4 = por %p2805_p3, %p2804_p2 }
  0x34   :  { %p2807_p5 = pnand %p2806_p4, %p2800_p1 }
  0x36   :  { %2810 = shalt.err (!%p2807_p5)
}
  0x37   :  { %s3559_s4 = smov 128   ;;  %s2972_s30 = smov 8  }
  0x38   :  { %s3568_s23 = sld [smem:[#allocation27_spill]]  ;;  %s2973_s1 = smov [#allocation7]  }
  0x39   :  { %s62_s2 = sshll.u32 %s2973_s1, 4  ;;  %s2974_s3 = smov [#allocation10]   ;;  %s63_s2 = int_to_ptr.vmem [resolvable:$true] %s62_s2 }
  0x3a   :  { %s83_s7 = sshll.u32 %s2974_s3, 4  ;;  %s2819_s24 = scalar_lea.vmem %s63_s2, 16  ;;  %s84_s7 = int_to_ptr.vmem [resolvable:$true] %s83_s7 }
  0x3b   :  { %p2820_p6 = scmp.ne.s32.totalorder %s63_s2, %s2819_s24  ;;  %s2823_s29 = scalar_lea.vmem %s63_s2, 32 }
  0x3c   :  { %p2824_p7 = scmp.lt.s32.totalorder %s63_s2, %s63_s2  ;;  %p2825_p8 = scmp.lt.s32.totalorder %s2823_s29, %s2819_s24 }
  0x3e   :  { %45 = dma.hbm_to_vmem [thread:$0]  %s3568_s23, 256, %s40_s26, [#allocation3], %s3559_s4, %s3559_s4, %s2972_s30  }
  0x3f   :  { %p2826_p9 = por %p2825_p8, %p2824_p7 }
  0x41   :  { %p2827_p10 = pnand %p2826_p9, %p2820_p6 }
  0x43   :  { %2830 = shalt.err (!%p2827_p10)
}
  0x44   :  { %s3569_s25 = sld [smem:[#allocation29_spill]]  ;;  %s2839_s5 = scalar_lea.vmem %s84_s7, 32 }
  0x45   :  { %p2840_p11 = scmp.ne.s32.totalorder %s84_s7, %s2839_s5  ;;  %p2844_p12 = scmp.lt.s32.totalorder %s84_s7, %s84_s7 }
  0x46   :  { %p2845_p13 = scmp.lt.s32.totalorder %s2839_s5, %s2839_s5 }
  0x48   :  { %p2846_p0 = por %p2845_p13, %p2844_p12 }
  0x4a   :  { %65 = dma.hbm_to_vmem [thread:$0]  %s3569_s25, 16, %s63_s2, [#allocation6]  }
  0x4b   :  { %p2847_p1 = pnand %p2846_p0, %p2840_p11 }
  0x4d   :  { %2850 = shalt.err (!%p2847_p1)
}
  0x4e   :  { %s3570_s26 = smov 16   ;;  %s3571_s1 = sld [smem:[#allocation32_spill]] }
  0x4f   :  { %s2975_s3 = smov [#allocation13]   ;;  %s2976_s29 = smov [#allocation14]  }
  0x50   :  { %s109_s24 = sshll.u32 %s2975_s3, 4  ;;  %s121_s4 = sshll.u32 %s2976_s29, 4  ;;  %s110_s24 = int_to_ptr.vmem [resolvable:$true] %s109_s24  ;;  %s122_s4 = int_to_ptr.vmem [resolvable:$true] %s121_s4 }
  0x51   :  { %s2859_s25 = scalar_lea.vmem %s110_s24, 32  ;;  %p2864_p3 = scmp.lt.s32.totalorder %s110_s24, %s110_s24 }
  0x52   :  { %p2860_p2 = scmp.ne.s32.totalorder %s110_s24, %s2859_s25  ;;  %p2865_p4 = scmp.lt.s32.totalorder %s2859_s25, %s2859_s25 }
  0x54   :  { %89 = dma.hbm_to_vmem [thread:$0]  %s3571_s1, 32, %s84_s7, [#allocation9], %s3570_s26, %s3570_s26, %s2970_s28  }
  0x55   :  { %p2866_p5 = por %p2865_p4, %p2864_p3 }
  0x57   :  { %p2867_p6 = pnand %p2866_p5, %p2860_p2 }
  0x59   :  { %2870 = shalt.err (!%p2867_p6)
}
  0x5a   :  { %115 = dma.hbm_to_vmem [thread:$0]  %s3542_s8, 32, %s110_s24, [#allocation12], %s3570_s26, %s3570_s26, %s2970_s28  }
  0x5b   :  { %s2879_s7 = scalar_lea.vmem %s122_s4, 32  ;;  %p2884_p8 = scmp.lt.s32.totalorder %s122_s4, %s122_s4 }
  0x5c   :  { %p2880_p7 = scmp.ne.s32.totalorder %s122_s4, %s2879_s7  ;;  %p2885_p9 = scmp.lt.s32.totalorder %s2879_s7, %s2879_s7 }
  0x5e   :  { %p2886_p10 = por %p2885_p9, %p2884_p8 }
  0x60   :  { %p2887_p11 = pnand %p2886_p10, %p2880_p7 }
  0x62   :  { %2890 = shalt.err (!%p2887_p11)
}
  0x63   :  { %127 = dma.hbm_to_vmem [thread:$0]  %s3543_s9, 32, %s122_s4, [#allocation15], %s3570_s26, %s3570_s26, %s2970_s28  }
  0x64   :  { %2951 = dma.done.wait [#allocation3], 256  }
  0x65   :  { %2952 = vsyncadd [#allocation3], 4294967040 }
  0x66   :  { %2953 = dma.done.wait [#allocation6], 48  }
  0x67   :  { %2954 = vsyncadd [#allocation6], 4294967248 }
  0x68   :  { %2955 = dma.done.wait [#allocation9], 48  }
  0x69   :  { %2956 = vsyncadd [#allocation9], 4294967248 }
  0x6a   :  { %2957 = dma.done.wait [#allocation12], 64  }
  0x6b   :  { %2958 = vsyncadd [#allocation12], 4294967232 }
  0x6c   :  { %2959 = dma.done.wait [#allocation15], 32  }
  0x6d   :  { %2960 = vsyncadd [#allocation15], 4294967264  ;;  %vm175_vm0 = vcmask 261120   ;;  %v171_v0 = vld [vmem:[#allocation2] sm:$0xff]  ;;  %v172_v1 = vld [vmem:[#allocation2 + $0x8] sm:$0xff]  ;;  %s3572_s28 = sld [smem:[#allocation31_spill]]  ;;  %v229_v59 = vlaneseq }
  0x6e   :  { %v176_v2 = vsel %vm175_vm0, %v171_v0, 0.0  ;;  %v179_v3 = vsel %vm175_vm0, %v172_v1, 0.0  ;;  %v2977_v15 = vmov 0.0   ;;  %vm2978_vm1 = vmmov 0   ;;  %v2271_v25 = vld [vmem:[#allocation7] ss:$0 sm:$0xff] }
  0x6f   :  { %177 = vadd.xlane.f32.xlu0 %v176_v2  ;;  %2428 = vmatprep.subr.bf16.mxu0 %v2977_v15  ;;  %v2272_v29 = vld [vmem:[#allocation8] ss:$0 sm:$0xff]  ;;  %v2273_v34 = vld [vmem:[#allocation10] ss:$0 sm:$0xff]  ;;  %s2979_s22 = smov 96   ;;  %s2980_s23 = smov 112  }
  0x70   :  { %2432 = vmatprep.mubr.msk.bf16.mxu0 %vm2978_vm1, %v2977_v15  ;;  %2436 = vmatprep.subr.bf16.mxu1 %v2977_v15  ;;  %vm357_vm2 = vcmask 130048   ;;  %v2981_v57 = vmov 1966171168   ;;  %v219_v60 = vld [vmem:[#allocation5] sm:$0x3]  ;;  %v230_v62 = vshrl.u32 %v229_v59, 7 }
  0x71   :  { %2438 = vmatprep.mubr.msk.bf16.mxu1 %vm2978_vm1, %v2977_v15  ;;  %v227_v58 = vunpack.c.l.s4 %v2981_v57  ;;  %v221_v63 = vrot.slane %v219_v60, 6  ;;  %vm223_vm3 = vcmask 1041408   ;;  %vm559_vm5 = vcmask 64512   ;;  %s2982_s1 = smov 64   ;;  %s2984_s2 = smov [#allocation16]  }
  0x72   :  { %vm613_vm9 = vcmask 1043456   ;;  %vm1094_vm10 = vcmask 523264   ;;  %vm2124_vm11 = vcmask 1041409   ;;  %vm2207_vm13 = vcmask 1024  }
  0x73   :  { %180 = vadd.xlane.f32.xlu0 %v179_v3  ;;  %v2645_v14 = vld [vmem:[%s3572_s28 + $0x8] sm:$0xff]   ;;  %v2646_v16 = vld [vmem:[%s3572_s28] sm:$0xff]   ;;  %v228_v61 = vunpack.c.0.s8 %v227_v58 }
  0x74   :  { %2429 = vmatpush3.bf16.msra.mxu0 %v2645_v14 }
  0x75   :  { %2430 = vmatprep.subr.bf16.mxu0 %v2977_v15 }
  0x78   :  { %2431 = vmatpush3.bf16.msra.mxu0 %v2646_v16 }
  0x79   :  { %2442 = vmatprep.subr.bf16.mxu0 %v2977_v15 }
  0xf8   :  { %v178_v4 = vpop.xlane.xlu0 %177 }
  0xf9   :  { %v183_v5 = vmul.f32 0.03125, %v178_v4  ;;  %v252_v4 = vsub.s32 0, %v230_v62 }
  0xfb   :  { %v185_v6 = vsub.f32 %v171_v0, %v183_v5  ;;  %v231_v0 = vsub.s32 %v228_v61, %v230_v62 }
  0xfc   :  { %v181_v7 = vpop.xlane.xlu0 %180 }
  0xfd   :  { %v184_v8 = vmul.f32 0.03125, %v181_v7  ;;  %v187_v9 = vmul.f32 %v185_v6, %v185_v6 }
  0xff   :  { %v186_v10 = vsub.f32 %v172_v1, %v184_v8  ;;  %v189_v11 = vsel %vm175_vm0, %v187_v9, 0.0  ;;  %v224_v1 = vsel %vm223_vm3, %v219_v60, %v221_v63 }
 0x100   :  { %190 = vadd.xlane.f32.xlu1 %v189_v11  ;;  %v232_v2 = vrot.slane %v224_v1, %v231_v0 }
 0x101   :  { %v188_v12 = vmul.f32 %v186_v10, %v186_v10 }
 0x102   :  { %v240_v3 = vrot.slane %v232_v2, %v231_v0  ;;  %v233_v5 = vcombine.high %v232_v2, %v232_v2 }
 0x103   :  { %v192_v13 = vsel %vm175_vm0, %v188_v12, 0.0 }
 0x104   :  { %193 = vadd.xlane.f32.xlu1 %v192_v13  ;;  %v247_v7 = vrot.slane %v233_v5, %v231_v0 }
 0x189   :  { %v191_v17 = vpop.xlane.xlu1 %190 }
 0x18a   :  { %v195_v18 = vmul.f32 0.03125, %v191_v17 }
 0x18c   :  { %v197_v19 = vadd.f32 1e-12, %v195_v18 }
 0x18d   :  { %v194_v20 = vpop.xlane.xlu1 %193 }
 0x18e   :  { %2667 = vrsqrt.f32 %v197_v19  ;;  %v196_v21 = vmul.f32 0.03125, %v194_v20 }
 0x190   :  { %v198_v22 = vadd.f32 1e-12, %v196_v21 }
 0x192   :  { %2669 = vrsqrt.f32 %v198_v22 }
 0x19b   :  { %v2668_v23 = vpop.eup %2667 }
 0x19c   :  { %v201_v24 = vmul.f32 %v2668_v23, %v185_v6  ;;  %v253_v6 = vrot.slane %v240_v3, %v252_v4 }
 0x19e   :  { %v209_v28 = vmul.f32 %v2271_v25, %v201_v24  ;;  %vm3205_vm4 = vcmp.gt.f32.partialorder %v253_v6, 0.5 }
 0x19f   :  { %v2670_v26 = vpop.eup %2669 }
 0x1a0   :  { %v202_v27 = vmul.f32 %v2670_v26, %v186_v10  ;;  %v3153_v31 = vadd.f32 %v2272_v29, %v209_v28  ;;  %v257_v10 = vrot.slane %v247_v7, %v252_v4  ;;  %v248_v26 = vcombine.high %v240_v3, %v240_v3 }
 0x1a2   :  { %v210_v30 = vmul.f32 %v2271_v25, %v202_v27  ;;  %vm3212_vm6 = vcmp.gt.f32.partialorder %v257_v10, 0.5  ;;  %v249_v27 = vcombine.high %v247_v7, %v247_v7  ;;  %v3221_v28 = vrot.slane %v248_v26, %v252_v4 }
 0x1a4   :  { %v3155_v32 = vadd.f32 %v2272_v29, %v210_v30  ;;  %v3223_v29 = vrot.slane %v249_v27, %v252_v4  ;;  %vm272_vm7 = vcmp.gt.f32.partialorder %v3221_v28, 0.5 }
 0x1a6   :  { %v274_v33 = vpack.c.bf16 %v3155_v32, %v3153_v31  ;;  %vm273_vm8 = vcmp.gt.f32.partialorder %v3223_v29, 0.5 }
 0x1a8   :  { %2433 = vmatmul.mubr.msk.bf16.vlgmr.msra.gmra.mxu0 %vm175_vm0, %v274_v33 }
 0x1a9   :  { %2444 = vmatprep.mubr.msk.bf16.mxu0 %vm2978_vm1, %v2977_v15 }
 0x268   :  { %v335_v35 = vpop.f32.mrf.mxu0 }
 0x269   :  { %v336_v36 = vadd.f32 %v2273_v34, %v335_v35 }
 0x26a   :  { %v2434_v37 = vpop.f32.mrf.mxu0 }
 0x26b   :  { %v3162_v38 = vpack.c.bf16 %v336_v36, %v336_v36 }
 0x26c   :  { %v338_v39 = vpop.f32.mrf.mxu0 }
 0x26d   :  { %v339_v40 = vadd.f32 %v2273_v34, %v338_v39  ;;  %355 = vrot.lane.b32.xlu1 %v3162_v38, %s2979_s22 }
 0x26e   :  { %v2435_v41 = vpop.f32.mrf.mxu0 }
 0x26f   :  { %v2635_v42 = vpack.i.bf16 %v339_v40, %v336_v36  ;;  %v3166_v43 = vpack.c.bf16 %v339_v40, %v339_v40 }
 0x271   :  { %2636 = vrot.lane.b32.xlu0 %v2635_v42, %s2980_s23  ;;  %405 = vrot.lane.b32.xlu1 %v3166_v43, %s2979_s22 }
 0x2df   :  { %v356_v44 = vpop.permute.xlu1 %355 }
 0x2e0   :  { %v362_v45 = vsel %vm357_vm2, %v356_v44, 0 }
 0x2e1   :  { %2437 = vmatpush3.bf16.xpose.msra.mxu1 %v362_v45 }
 0x2e2   :  { %2448 = vmatprep.subr.bf16.mxu1 %v2977_v15 }
 0x2e3   :  { %v2637_v46 = vpop.permute.xlu0 %2636  ;;  %v406_v47 = vpop.permute.xlu1 %405 }
 0x2e4   :  { %v2639_v48 = vunpack.i.h.bf16 %v2637_v46  ;;  %v2638_v49 = vunpack.i.l.bf16 %v2637_v46  ;;  %v411_v50 = vsel %vm357_vm2, %v406_v47, 0 }
 0x2e5   :  { %2443 = vmatpush3.bf16.xpose.msra.mxu0 %v411_v50 }
 0x2e6   :  { %v3174_v51 = vpack.c.bf16 %v2639_v48, %v2639_v48  ;;  %v3176_v52 = vpack.c.bf16 %v2638_v49, %v2638_v49  ;;  %2454 = vmatprep.subr.bf16.mxu0 %v2977_v15 }
 0x2e8   :  { %2439 = vmatmul.mubr.msk.bf16.vlgmr.msra.gmra.mxu1 %vm357_vm2, %v3162_v38  ;;  %503 = vrot.lane.b32.xlu0 %v3174_v51, %s2979_s22 }
 0x2e9   :  { %454 = vrot.lane.b32.xlu1 %v3176_v52, %s2979_s22  ;;  %2450 = vmatprep.mubr.msk.bf16.mxu1 %vm2978_vm1, %v2977_v15 }
 0x2ec   :  { %2445 = vmatmul.mubr.msk.bf16.vlgmr.msra.gmra.mxu0 %vm357_vm2, %v3166_v43 }
 0x2ed   :  { %2456 = vmatprep.mubr.msk.bf16.mxu0 %vm2978_vm1, %v2977_v15 }
 0x35a   :  { %v504_v53 = vpop.permute.xlu0 %503 }
 0x35b   :  { %v509_v54 = vsel %vm357_vm2, %v504_v53, 0  ;;  %v455_v55 = vpop.permute.xlu1 %454 }
 0x35c   :  { %v460_v56 = vsel %vm357_vm2, %v455_v55, 0  ;;  %2455 = vmatpush3.bf16.xpose.msra.mxu0 %v509_v54 }
 0x35d   :  { %2449 = vmatpush3.bf16.xpose.msra.mxu1 %v460_v56  ;;  %2466 = vmatprep.subr.bf16.mxu0 %v2977_v15 }
 0x35e   :  { %2460 = vmatprep.subr.bf16.mxu1 %v2977_v15 }
 0x363   :  { %2457 = vmatmul.mubr.msk.bf16.vlgmr.msra.gmra.mxu0 %vm357_vm2, %v3174_v51 }
 0x364   :  { %2451 = vmatmul.mubr.msk.bf16.vlgmr.msra.gmra.mxu1 %vm357_vm2, %v3176_v52  ;;  %2468 = vmatprep.mubr.msk.bf16.mxu0 %vm2978_vm1, %v2977_v15 }
 0x365   :  { %2462 = vmatprep.mubr.msk.bf16.mxu1 %vm2978_vm1, %v2977_v15 }
 0x3a8   :  { %v398_v8 = vpop.f32.mrf.mxu1 }
 0x3a9   :  { %v551_v11 = vmul.f32 0.25, %v398_v8 }
 0x3aa   :  { %v2440_v12 = vpop.f32.mrf.mxu1 }
 0x3ab   :  { %v555_v13 = vsel %vm3205_vm4, %v551_v11, -1e+30 }
 0x3ac   :  { %v401_v14 = vpop.f32.mrf.mxu1  ;;  %v447_v16 = vpop.f32.mrf.mxu0  ;;  %v560_v17 = vsel %vm559_vm5, %v555_v13, -inf }
 0x3ad   :  { %v552_v19 = vmul.f32 0.25, %v447_v16  ;;  %561 = vmax.xlane.f32.xlu1 %v560_v17 }
 0x3ae   :  { %v2441_v20 = vpop.f32.mrf.mxu1  ;;  %v2446_v21 = vpop.f32.mrf.mxu0 }
 0x3af   :  { %v556_v22 = vsel %vm3212_vm6, %v552_v19, -1e+30 }
 0x3b0   :  { %v450_v23 = vpop.f32.mrf.mxu0  ;;  %v563_v24 = vsel %vm559_vm5, %v556_v22, -inf }
 0x3b1   :  { %564 = vmax.xlane.f32.xlu0 %v563_v24 }
 0x3b2   :  { %v2447_v25 = vpop.f32.mrf.mxu0 }
 0x3be   :  { %608 = vrot.lane.b32.xlu1 %v3162_v38, %s2982_s1 }
 0x423   :  { %v545_v30 = vpop.f32.mrf.mxu0 }
 0x424   :  { %v496_v33 = vpop.f32.mrf.mxu1  ;;  %v554_v35 = vmul.f32 0.25, %v545_v30 }
 0x425   :  { %v553_v34 = vmul.f32 0.25, %v496_v33  ;;  %v2458_v36 = vpop.f32.mrf.mxu0 }
 0x426   :  { %v2452_v37 = vpop.f32.mrf.mxu1  ;;  %v558_v44 = vsel %vm273_vm8, %v554_v35, -1e+30  ;;  %v2648_v35 = vld [vmem:[%s3540_s6 + $0x8] sm:$0xff]  }
 0x427   :  { %v548_v39 = vpop.f32.mrf.mxu0  ;;  %v557_v38 = vsel %vm272_vm7, %v553_v34, -1e+30  ;;  %v569_v46 = vsel %vm559_vm5, %v558_v44, -inf  ;;  %v2647_v34 = vld [vmem:[%s3540_s6] sm:$0xff]  }
 0x428   :  { %v499_v40 = vpop.f32.mrf.mxu1  ;;  %v566_v41 = vsel %vm559_vm5, %v557_v38, -inf }
 0x429   :  { %567 = vmax.xlane.f32.xlu0 %v566_v41  ;;  %v2459_v42 = vpop.f32.mrf.mxu0 }
 0x42a   :  { %v2453_v45 = vpop.f32.mrf.mxu1 }
 0x42d   :  { %570 = vmax.xlane.f32.xlu0 %v569_v46 }
 0x436   :  { %v562_v47 = vpop.xlane.xlu1 %561 }
 0x437   :  { %v572_v48 = vsub.f32 %v555_v13, %v562_v47 }
 0x439   :  { %v576_v49 = vmul.f32 1.442695, %v572_v48 }
 0x43a   :  { %v609_v50 = vpop.permute.xlu1 %608  ;;  %v565_v53 = vpop.xlane.xlu0 %564 }
 0x43b   :  { %2671 = vpow2.f32 %v576_v49  ;;  %v615_v54 = vsel %vm613_vm9, %v609_v50, 0  ;;  %v573_v55 = vsub.f32 %v556_v22, %v565_v53 }
 0x43c   :  { %2461 = vmatpush3.bf16.msra.mxu1 %v615_v54 }
 0x43d   :  { %v578_v56 = vmul.f32 1.442695, %v573_v55  ;;  %2472 = vmatprep.subr.bf16.mxu1 %v2977_v15 }
 0x43f   :  { %2673 = vpow2.f32 %v578_v56 }
 0x448   :  { %v2672_v57 = vpop.eup %2671 }
 0x449   :  { %v584_v58 = vsel %vm559_vm5, %v2672_v57, 0.0 }
 0x44a   :  { %585 = vadd.xlane.f32.xlu1 %v584_v58 }
 0x44c   :  { %v2674_v60 = vpop.eup %2673 }
 0x44d   :  { %v587_v61 = vsel %vm559_vm5, %v2674_v60, 0.0 }
 0x44e   :  { %588 = vadd.xlane.f32.xlu0 %v587_v61 }
 0x4b2   :  { %v568_v62 = vpop.xlane.xlu0 %567 }
 0x4b3   :  { %v574_v63 = vsub.f32 %v557_v38, %v568_v62 }
 0x4b5   :  { %v580_v0 = vmul.f32 1.442695, %v574_v63 }
 0x4b6   :  { %v571_v1 = vpop.xlane.xlu0 %570 }
 0x4b7   :  { %2675 = vpow2.f32 %v580_v0  ;;  %v575_v2 = vsub.f32 %v558_v44, %v571_v1  ;;  %v2289_v1 = vld [vmem:[#allocation11] ss:$0 sm:$0xff] }
 0x4b9   :  { %v582_v3 = vmul.f32 1.442695, %v575_v2 }
 0x4bb   :  { %2677 = vpow2.f32 %v582_v3 }
 0x4c4   :  { %v2676_v4 = vpop.eup %2675 }
 0x4c5   :  { %v590_v5 = vsel %vm559_vm5, %v2676_v4, 0.0 }
 0x4c6   :  { %591 = vadd.xlane.f32.xlu1 %v590_v5 }
 0x4c8   :  { %v2678_v6 = vpop.eup %2677 }
 0x4c9   :  { %v593_v7 = vsel %vm559_vm5, %v2678_v6, 0.0 }
 0x4ca   :  { %594 = vadd.xlane.f32.xlu0 %v593_v7 }
 0x4d3   :  { %v586_v8 = vpop.xlane.xlu1 %585 }
 0x4d4   :  { %2679 = vrcp.f32 %v586_v8 }
 0x4d7   :  { %705 = vrot.lane.b32.xlu1 %v3176_v52, %s2982_s1  ;;  %v589_v13 = vpop.xlane.xlu0 %588 }
 0x4d8   :  { %2681 = vrcp.f32 %v589_v13 }
 0x4db   :  { %753 = vrot.lane.b32.xlu1 %v3174_v51, %s2982_s1 }
 0x4e0   :  { %657 = vrot.lane.b32.xlu0 %v3166_v43, %s2982_s1 }
 0x4e1   :  { %v2680_v10 = vpop.eup %2679 }
 0x4e2   :  { %v600_v11 = vmul.f32 %v2680_v10, %v2672_v57 }
 0x4e4   :  { %v604_v12 = vpack.c.bf16 %v600_v11, %v600_v11 }
 0x4e5   :  { %v2682_v16 = vpop.eup %2681 }
 0x4e6   :  { %2463 = vmatmul.mubr.msk.bf16.vlgmr.msra.gmra.mxu1 %vm559_vm5, %v604_v12  ;;  %v601_v43 = vmul.f32 %v2682_v16, %v2674_v60 }
 0x4e7   :  { %2474 = vmatprep.mubr.msk.bf16.mxu1 %vm2978_vm1, %v2977_v15 }
 0x4e8   :  { %v605_v22 = vpack.c.bf16 %v601_v43, %v601_v43 }
 0x54f   :  { %v592_v14 = vpop.xlane.xlu1 %591 }
 0x550   :  { %2683 = vrcp.f32 %v592_v14 }
 0x553   :  { %v706_v52 = vpop.permute.xlu1 %705  ;;  %v595_v17 = vpop.xlane.xlu0 %594 }
 0x554   :  { %v711_v51 = vsel %vm613_vm9, %v706_v52, 0  ;;  %2685 = vrcp.f32 %v595_v17 }
 0x555   :  { %2473 = vmatpush3.bf16.msra.mxu1 %v711_v51 }
 0x556   :  { %2484 = vmatprep.subr.bf16.mxu1 %v2977_v15 }
 0x557   :  { %v658_v19 = vpop.permute.xlu0 %657  ;;  %v754_v21 = vpop.permute.xlu1 %753 }
 0x558   :  { %v663_v20 = vsel %vm613_vm9, %v658_v19, 0  ;;  %v759_v23 = vsel %vm613_vm9, %v754_v21, 0 }
 0x559   :  { %2467 = vmatpush3.bf16.msra.mxu0 %v663_v20 }
 0x55a   :  { %2478 = vmatprep.subr.bf16.mxu0 %v2977_v15 }
 0x55c   :  { %2469 = vmatmul.mubr.msk.bf16.vlgmr.msra.gmra.mxu0 %vm559_vm5, %v605_v22 }
 0x55d   :  { %v2684_v24 = vpop.eup %2683  ;;  %2479 = vmatpush3.bf16.msra.mxu0 %v759_v23  ;;  %2480 = vmatprep.mubr.msk.bf16.mxu0 %vm2978_vm1, %v2977_v15 }
 0x55e   :  { %v602_v25 = vmul.f32 %v2684_v24, %v2676_v4  ;;  %2490 = vmatprep.subr.bf16.mxu0 %v2977_v15  ;;  %v2650_v24 = vld [vmem:[%s3544_s10] sm:$0xff]  }
 0x560   :  { %v606_v26 = vpack.c.bf16 %v602_v25, %v602_v25 }
 0x561   :  { %v2686_v27 = vpop.eup %2685 }
 0x562   :  { %2475 = vmatmul.mubr.msk.bf16.vlgmr.msra.gmra.mxu1 %vm559_vm5, %v606_v26  ;;  %v603_v30 = vmul.f32 %v2686_v27, %v2678_v6 }
 0x563   :  { %2486 = vmatprep.mubr.msk.bf16.mxu1 %vm2978_vm1, %v2977_v15  ;;  %2485 = vmatpush3.bf16.msra.mxu1 %v2647_v34 }
 0x564   :  { %v607_v33 = vpack.c.bf16 %v603_v30, %v603_v30  ;;  %2496 = vmatprep.subr.bf16.mxu1 %v2977_v15 }
 0x566   :  { %2481 = vmatmul.mubr.msk.bf16.vlgmr.msra.gmra.mxu0 %vm559_vm5, %v607_v33 }
 0x567   :  { %2492 = vmatprep.mubr.msk.bf16.mxu0 %vm2978_vm1, %v2977_v15  ;;  %2491 = vmatpush3.bf16.msra.mxu0 %v2648_v35 }
 0x568   :  { %2504 = vmatprep.subr.bf16.mxu0 %v2977_v15 }
 0x5a6   :  { %v651_v36 = vpop.f32.mrf.mxu1 }
 0x5a8   :  { %v2464_v37 = vpop.f32.mrf.mxu1 }
 0x5a9   :  { %v2290_v37 = vld [vmem:[#allocation13] ss:$0 sm:$0xff] }
 0x5aa   :  { %v654_v39 = vpop.f32.mrf.mxu1 }
 0x5ac   :  { %v2465_v38 = vpop.f32.mrf.mxu1 }
 0x61c   :  { %v699_v40 = vpop.f32.mrf.mxu0 }
 0x61d   :  { %v801_v41 = vpack.c.bf16 %v699_v40, %v651_v36 }
 0x61e   :  { %v2470_v42 = vpop.f32.mrf.mxu0 }
 0x61f   :  { %2487 = vmatmul.mubr.msk.bf16.vlgmr.msra.gmra.mxu1 %vm357_vm2, %v801_v41  ;;  %v2291_v41 = vld [vmem:[#allocation14] ss:$0 sm:$0xff] }
 0x620   :  { %v702_v44 = vpop.f32.mrf.mxu0  ;;  %2500 = vmatprep.mubr.msk.bf16.mxu1 %vm2978_vm1, %v2977_v15 }
 0x622   :  { %v2471_v45 = vpop.f32.mrf.mxu0  ;;  %v747_v46 = vpop.f32.mrf.mxu1 }
 0x624   :  { %v2476_v47 = vpop.f32.mrf.mxu1 }
 0x625   :  { %v2651_v47 = vld [vmem:[%s3546_s12 + $0x18] sm:$0xff]  }
 0x626   :  { %v750_v48 = vpop.f32.mrf.mxu1  ;;  %v795_v49 = vpop.f32.mrf.mxu0 }
 0x627   :  { %v802_v50 = vpack.c.bf16 %v795_v49, %v747_v46  ;;  %v2652_v48 = vld [vmem:[%s3546_s12 + $0x10] sm:$0xff]   ;;  %v2653_v49 = vld [vmem:[%s3546_s12 + $0x8] sm:$0xff]  }
 0x628   :  { %v2477_v53 = vpop.f32.mrf.mxu1  ;;  %v2482_v54 = vpop.f32.mrf.mxu0 }
 0x629   :  { %2493 = vmatmul.mubr.msk.bf16.vlgmr.msra.gmra.mxu0 %vm357_vm2, %v802_v50  ;;  %v2654_v50 = vld [vmem:[%s3546_s12] sm:$0xff]  }
 0x62a   :  { %v798_v55 = vpop.f32.mrf.mxu0  ;;  %2512 = vmatprep.mubr.msk.bf16.mxu0 %vm2978_vm1, %v2977_v15  ;;  %2505 = vmatpush3.bf16.msra.mxu0 %v2651_v47  ;;  %v2292_v53 = vld [vmem:[%s3545_s11] ss:$0 sm:$0xff] }
 0x62b   :  { %2506 = vmatprep.subr.bf16.mxu0 %v2977_v15 }
 0x62c   :  { %v2483_v56 = vpop.f32.mrf.mxu0 }
 0x62e   :  { %2507 = vmatpush3.bf16.msra.mxu0 %v2652_v48 }
 0x62f   :  { %2508 = vmatprep.subr.bf16.mxu0 %v2977_v15 }
 0x632   :  { %2509 = vmatpush3.bf16.msra.mxu0 %v2653_v49 }
 0x633   :  { %2510 = vmatprep.subr.bf16.mxu0 %v2977_v15 }
 0x636   :  { %2511 = vmatpush3.bf16.msra.mxu0 %v2654_v50  ;;  %v2302_v50 = vld [vmem:[%s3548_s14] ss:$0 sm:$0xff] }
 0x637   :  { %2530 = vmatprep.subr.bf16.mxu0 %v2977_v15 }
 0x6df   :  { %v850_v57 = vpop.f32.mrf.mxu1 }
 0x6e0   :  { %v907_v63 = vsel %vm175_vm0, %v850_v57, 0.0 }
 0x6e1   :  { %v2488_v58 = vpop.f32.mrf.mxu1 }
 0x6e3   :  { %v853_v60 = vpop.f32.mrf.mxu1 }
 0x6e4   :  { %v910_v6 = vsel %vm175_vm0, %v853_v60, 0.0 }
 0x6e5   :  { %v2489_v61 = vpop.f32.mrf.mxu1 }
 0x6e9   :  { %v900_v62 = vpop.f32.mrf.mxu0 }
 0x6ea   :  { %v908_v0 = vsel %vm175_vm0, %v900_v62, 0.0 }
 0x6eb   :  { %v909_v2 = vadd.f32 %v908_v0, %v907_v63  ;;  %v2494_v3 = vpop.f32.mrf.mxu0 }
 0x6ed   :  { %v920_v4 = vadd.f32 %v2289_v1, %v909_v2  ;;  %v903_v5 = vpop.f32.mrf.mxu0 }
 0x6ee   :  { %v911_v7 = vsel %vm175_vm0, %v903_v5, 0.0 }
 0x6ef   :  { %v912_v8 = vadd.f32 %v911_v7, %v910_v6  ;;  %v2495_v10 = vpop.f32.mrf.mxu0  ;;  %v922_v11 = vadd.f32 %v920_v4, %v3153_v31 }
 0x6f1   :  { %v921_v12 = vadd.f32 %v2289_v1, %v912_v8  ;;  %v926_v13 = vsel %vm175_vm0, %v922_v11, 0.0 }
 0x6f2   :  { %927 = vadd.xlane.f32.xlu1 %v926_v13 }
 0x6f3   :  { %v923_v14 = vadd.f32 %v921_v12, %v3155_v32  ;;  %v2649_v32 = vld [vmem:[%s3544_s10 + $0x8] sm:$0xff]  }
 0x6f4   :  { %2497 = vmatpush3.bf16.msra.mxu1 %v2649_v32 }
 0x6f5   :  { %v929_v16 = vsel %vm175_vm0, %v923_v14, 0.0  ;;  %2498 = vmatprep.subr.bf16.mxu1 %v2977_v15 }
 0x6f6   :  { %930 = vadd.xlane.f32.xlu0 %v929_v16 }
 0x6f8   :  { %2499 = vmatpush3.bf16.msra.mxu1 %v2650_v24 }
 0x6f9   :  { %2516 = vmatprep.subr.bf16.mxu1 %v2977_v15 }
 0x77b   :  { %v928_v52 = vpop.xlane.xlu1 %927 }
 0x77c   :  { %v932_v17 = vmul.f32 0.03125, %v928_v52 }
 0x77e   :  { %v934_v51 = vsub.f32 %v922_v11, %v932_v17  ;;  %v2296_v17 = vld [vmem:[%s3547_s13] ss:$0 sm:$0xff] }
 0x77f   :  { %v931_v43 = vpop.xlane.xlu0 %930 }
 0x780   :  { %v933_v19 = vmul.f32 0.03125, %v931_v43  ;;  %v936_v20 = vmul.f32 %v934_v51, %v934_v51 }
 0x782   :  { %v935_v21 = vsub.f32 %v923_v14, %v933_v19  ;;  %v938_v22 = vsel %vm175_vm0, %v936_v20, 0.0 }
 0x783   :  { %939 = vadd.xlane.f32.xlu0 %v938_v22 }
 0x784   :  { %v937_v31 = vmul.f32 %v935_v21, %v935_v21 }
 0x786   :  { %v941_v23 = vsel %vm175_vm0, %v937_v31, 0.0 }
 0x787   :  { %942 = vadd.xlane.f32.xlu0 %v941_v23 }
 0x80c   :  { %v940_v25 = vpop.xlane.xlu0 %939 }
 0x80d   :  { %v944_v26 = vmul.f32 0.03125, %v940_v25 }
 0x80f   :  { %v946_v27 = vadd.f32 1e-12, %v944_v26 }
 0x810   :  { %v943_v30 = vpop.xlane.xlu0 %942 }
 0x811   :  { %2687 = vrsqrt.f32 %v946_v27  ;;  %v945_v33 = vmul.f32 0.03125, %v943_v30 }
 0x813   :  { %v947_v34 = vadd.f32 1e-12, %v945_v33 }
 0x815   :  { %2689 = vrsqrt.f32 %v947_v34 }
 0x81e   :  { %v2688_v35 = vpop.eup %2687 }
 0x81f   :  { %v950_v36 = vmul.f32 %v2688_v35, %v934_v51 }
 0x821   :  { %v958_v40 = vmul.f32 %v2290_v37, %v950_v36 }
 0x822   :  { %v2690_v39 = vpop.eup %2689 }
 0x823   :  { %v951_v38 = vmul.f32 %v2690_v39, %v935_v21  ;;  %v966_v44 = vadd.f32 %v2291_v41, %v958_v40  ;;  %v2656_v40 = vld [vmem:[%s3572_s28 + $0x10] sm:$0xff]  }
 0x825   :  { %v959_v42 = vmul.f32 %v2290_v37, %v951_v38  ;;  %v2655_v38 = vld [vmem:[%s3572_s28 + $0x18] sm:$0xff]  }
 0x827   :  { %v967_v45 = vadd.f32 %v2291_v41, %v959_v42 }
 0x829   :  { %v968_v46 = vpack.c.bf16 %v967_v45, %v966_v44 }
 0x82b   :  { %2501 = vmatmul.mubr.msk.bf16.vlgmr.msra.gmra.mxu1 %vm175_vm0, %v968_v46 }
 0x82c   :  { %2520 = vmatprep.mubr.msk.bf16.mxu1 %vm2978_vm1, %v2977_v15  ;;  %2517 = vmatpush3.bf16.msra.mxu1 %v2655_v38 }
 0x82d   :  { %2518 = vmatprep.subr.bf16.mxu1 %v2977_v15 }
 0x830   :  { %2519 = vmatpush3.bf16.msra.mxu1 %v2656_v40 }
 0x831   :  { %2524 = vmatprep.subr.bf16.mxu1 %v2977_v15 }
 0x8eb   :  { %v1029_v54 = vpop.f32.mrf.mxu1 }
 0x8ec   :  { %v1030_v55 = vadd.f32 %v2292_v53, %v1029_v54 }
 0x8ed   :  { %v2502_v56 = vpop.f32.mrf.mxu1 }
 0x8ee   :  { %v1036_v57 = vmul.f32 %v1030_v55, %v1030_v55  ;;  %v2303_v56 = vld [vmem:[%s3549_s15] ss:$0 sm:$0xff] }
 0x8ef   :  { %v1032_v58 = vpop.f32.mrf.mxu1 }
 0x8f0   :  { %v1038_v60 = vmul.f32 %v1036_v57, %v1030_v55  ;;  %v1033_v61 = vadd.f32 %v2292_v53, %v1032_v58 }
 0x8f1   :  { %v2503_v62 = vpop.f32.mrf.mxu1 }
 0x8f2   :  { %v1040_v63 = vmul.f32 0.044715, %v1038_v60  ;;  %v1037_v0 = vmul.f32 %v1033_v61, %v1033_v61  ;;  %v2308_v62 = vld [vmem:[#allocation10 + $0x1] ss:$0 sm:$0xff] }
 0x8f4   :  { %v1042_v1 = vadd.f32 %v1040_v63, %v1030_v55  ;;  %v1039_v2 = vmul.f32 %v1037_v0, %v1033_v61 }
 0x8f6   :  { %v1044_v3 = vmul.f32 0.7978846, %v1042_v1  ;;  %v1041_v4 = vmul.f32 0.044715, %v1039_v2 }
 0x8f8   :  { %2691 = vtanh.f32 %v1044_v3  ;;  %v1043_v5 = vadd.f32 %v1041_v4, %v1033_v61 }
 0x8fa   :  { %v1045_v6 = vmul.f32 0.7978846, %v1043_v5 }
 0x8fc   :  { %2693 = vtanh.f32 %v1045_v6 }
 0x905   :  { %v2692_v7 = vpop.eup %2691 }
 0x906   :  { %v1048_v8 = vadd.f32 1.0, %v2692_v7 }
 0x908   :  { %v1050_v11 = vmul.f32 0.5, %v1048_v8 }
 0x909   :  { %v2694_v10 = vpop.eup %2693 }
 0x90a   :  { %v1049_v12 = vadd.f32 1.0, %v2694_v10  ;;  %v1052_v14 = vmul.f32 %v1050_v11, %v1030_v55 }
 0x90c   :  { %v1051_v13 = vmul.f32 0.5, %v1049_v12 }
 0x90e   :  { %v1053_v16 = vmul.f32 %v1051_v13, %v1033_v61 }
 0x910   :  { %v1054_v52 = vpack.c.bf16 %v1053_v16, %v1052_v14 }
 0x912   :  { %2513 = vmatmul.mubr.msk.bf16.vlgmr.msra.gmra.mxu0 %vm1094_vm10, %v1054_v52 }
 0x913   :  { %2532 = vmatprep.mubr.msk.bf16.mxu0 %vm2978_vm1, %v2977_v15 }
 0x9d2   :  { %v1132_v51 = vpop.f32.mrf.mxu0 }
 0x9d3   :  { %v1133_v43 = vadd.f32 %v2296_v17, %v1132_v51 }
 0x9d4   :  { %v2514_v19 = vpop.f32.mrf.mxu0 }
 0x9d5   :  { %v1139_v20 = vadd.f32 %v1133_v43, %v966_v44 }
 0x9d6   :  { %v1135_v21 = vpop.f32.mrf.mxu0 }
 0x9d7   :  { %v1136_v22 = vadd.f32 %v2296_v17, %v1135_v21  ;;  %v1143_v31 = vsel %vm175_vm0, %v1139_v20, 0.0 }
 0x9d8   :  { %1144 = vadd.xlane.f32.xlu1 %v1143_v31  ;;  %v2515_v23 = vpop.f32.mrf.mxu0 }
 0x9d9   :  { %v1140_v32 = vadd.f32 %v1136_v22, %v967_v45 }
 0x9db   :  { %v1146_v24 = vsel %vm175_vm0, %v1140_v32, 0.0 }
 0x9dc   :  { %1147 = vadd.xlane.f32.xlu0 %v1146_v24 }
 0xa61   :  { %v1145_v25 = vpop.xlane.xlu1 %1144 }
 0xa62   :  { %v1149_v26 = vmul.f32 0.03125, %v1145_v25 }
 0xa64   :  { %v1151_v27 = vsub.f32 %v1139_v20, %v1149_v26 }
 0xa65   :  { %v1148_v30 = vpop.xlane.xlu0 %1147 }
 0xa66   :  { %v1150_v33 = vmul.f32 0.03125, %v1148_v30  ;;  %v1153_v34 = vmul.f32 %v1151_v27, %v1151_v27 }
 0xa68   :  { %v1152_v35 = vsub.f32 %v1140_v32, %v1150_v33  ;;  %v1155_v36 = vsel %vm175_vm0, %v1153_v34, 0.0 }
 0xa69   :  { %1156 = vadd.xlane.f32.xlu1 %v1155_v36 }
 0xa6a   :  { %v1154_v37 = vmul.f32 %v1152_v35, %v1152_v35 }
 0xa6c   :  { %v1158_v39 = vsel %vm175_vm0, %v1154_v37, 0.0 }
 0xa6d   :  { %1159 = vadd.xlane.f32.xlu0 %v1158_v39 }
 0xaf2   :  { %v1157_v41 = vpop.xlane.xlu1 %1156 }
 0xaf3   :  { %v1161_v42 = vmul.f32 0.03125, %v1157_v41 }
 0xaf5   :  { %v1163_v44 = vadd.f32 1e-12, %v1161_v42 }
 0xaf6   :  { %v1160_v45 = vpop.xlane.xlu0 %1159 }
 0xaf7   :  { %2695 = vrsqrt.f32 %v1163_v44  ;;  %v1162_v46 = vmul.f32 0.03125, %v1160_v45 }
 0xaf9   :  { %v1164_v47 = vadd.f32 1e-12, %v1162_v46 }
 0xafb   :  { %2697 = vrsqrt.f32 %v1164_v47 }
 0xb04   :  { %v2696_v48 = vpop.eup %2695 }
 0xb05   :  { %v1167_v49 = vmul.f32 %v2696_v48, %v1151_v27 }
 0xb07   :  { %v1175_v55 = vmul.f32 %v2302_v50, %v1167_v49 }
 0xb08   :  { %v2698_v53 = vpop.eup %2697 }
 0xb09   :  { %v1168_v54 = vmul.f32 %v2698_v53, %v1152_v35  ;;  %v3341_v58 = vadd.f32 %v2303_v56, %v1175_v55 }
 0xb0b   :  { %v1176_v57 = vmul.f32 %v2302_v50, %v1168_v54 }
 0xb0d   :  { %v3343_v60 = vadd.f32 %v2303_v56, %v1176_v57 }
 0xb0f   :  { %v1185_v61 = vpack.c.bf16 %v3343_v60, %v3341_v58 }
 0xb11   :  { %2521 = vmatmul.mubr.msk.bf16.vlgmr.msra.gmra.mxu1 %vm175_vm0, %v1185_v61 }
 0xb12   :  { %2526 = vmatprep.mubr.msk.bf16.mxu1 %vm2978_vm1, %v2977_v15 }
 0xbd1   :  { %v1248_v63 = vpop.f32.mrf.mxu1 }
 0xbd2   :  { %v1249_v0 = vadd.f32 %v2308_v62, %v1248_v63 }
 0xbd3   :  { %v2522_v1 = vpop.f32.mrf.mxu1 }
 0xbd4   :  { %v3350_v2 = vpack.c.bf16 %v1249_v0, %v1249_v0 }
 0xbd5   :  { %v1251_v3 = vpop.f32.mrf.mxu1 }
 0xbd6   :  { %v1252_v4 = vadd.f32 %v2308_v62, %v1251_v3  ;;  %1268 = vrot.lane.b32.xlu0 %v3350_v2, %s2979_s22 }
 0xbd7   :  { %v2523_v5 = vpop.f32.mrf.mxu1 }
 0xbd8   :  { %v2640_v6 = vpack.i.bf16 %v1252_v4, %v1249_v0  ;;  %v3355_v7 = vpack.c.bf16 %v1252_v4, %v1252_v4 }
 0xbda   :  { %2641 = vrot.lane.b32.xlu1 %v2640_v6, %s2980_s23 }
 0xbde   :  { %1317 = vrot.lane.b32.xlu1 %v3355_v7, %s2979_s22 }
 0xc48   :  { %v1269_v8 = vpop.permute.xlu0 %1268 }
 0xc49   :  { %v1274_v10 = vsel %vm357_vm2, %v1269_v8, 0 }
 0xc4a   :  { %2525 = vmatpush3.bf16.xpose.msra.mxu1 %v1274_v10 }
 0xc4b   :  { %2536 = vmatprep.subr.bf16.mxu1 %v2977_v15 }
 0xc4c   :  { %v2642_v11 = vpop.permute.xlu1 %2641 }
 0xc4d   :  { %v2643_v12 = vunpack.i.l.bf16 %v2642_v11  ;;  %v2644_v13 = vunpack.i.h.bf16 %v2642_v11 }
 0xc4f   :  { %v3361_v14 = vpack.c.bf16 %v2643_v12, %v2643_v12  ;;  %v3370_v17 = vpack.c.bf16 %v2644_v13, %v2644_v13 }
 0xc50   :  { %v1318_v16 = vpop.permute.xlu1 %1317 }
 0xc51   :  { %v1323_v52 = vsel %vm357_vm2, %v1318_v16, 0  ;;  %2527 = vmatmul.mubr.msk.bf16.vlgmr.msra.gmra.mxu1 %vm357_vm2, %v3350_v2  ;;  %1366 = vrot.lane.b32.xlu1 %v3361_v14, %s2979_s22 }
 0xc52   :  { %2531 = vmatpush3.bf16.xpose.msra.mxu0 %v1323_v52  ;;  %2538 = vmatprep.mubr.msk.bf16.mxu1 %vm2978_vm1, %v2977_v15 }
 0xc53   :  { %2542 = vmatprep.subr.bf16.mxu0 %v2977_v15 }
 0xc55   :  { %1415 = vrot.lane.b32.xlu1 %v3370_v17, %s2979_s22 }
 0xc59   :  { %2533 = vmatmul.mubr.msk.bf16.vlgmr.msra.gmra.mxu0 %vm357_vm2, %v3355_v7 }
 0xc5a   :  { %2544 = vmatprep.mubr.msk.bf16.mxu0 %vm2978_vm1, %v2977_v15 }
 0xcc3   :  { %v1367_v51 = vpop.permute.xlu1 %1366 }
 0xcc4   :  { %v1372_v43 = vsel %vm357_vm2, %v1367_v51, 0 }
 0xcc5   :  { %2537 = vmatpush3.bf16.xpose.msra.mxu1 %v1372_v43 }
 0xcc6   :  { %2548 = vmatprep.subr.bf16.mxu1 %v2977_v15 }
 0xcc7   :  { %v1416_v19 = vpop.permute.xlu1 %1415 }
 0xcc8   :  { %v1421_v20 = vsel %vm357_vm2, %v1416_v19, 0 }
 0xcc9   :  { %2543 = vmatpush3.bf16.xpose.msra.mxu0 %v1421_v20 }
 0xcca   :  { %2554 = vmatprep.subr.bf16.mxu0 %v2977_v15 }
 0xccc   :  { %2539 = vmatmul.mubr.msk.bf16.vlgmr.msra.gmra.mxu1 %vm357_vm2, %v3361_v14 }
 0xccd   :  { %2550 = vmatprep.mubr.msk.bf16.mxu1 %vm2978_vm1, %v2977_v15 }
 0xcd0   :  { %2545 = vmatmul.mubr.msk.bf16.vlgmr.msra.gmra.mxu0 %vm357_vm2, %v3370_v17 }
 0xcd1   :  { %2556 = vmatprep.mubr.msk.bf16.mxu0 %vm2978_vm1, %v2977_v15 }
 0xd11   :  { %v1310_v21 = vpop.f32.mrf.mxu1 }
 0xd12   :  { %v1463_v22 = vmul.f32 0.25, %v1310_v21 }
 0xd13   :  { %v2528_v31 = vpop.f32.mrf.mxu1 }
 0xd14   :  { %v1467_v23 = vsel %vm3205_vm4, %v1463_v22, -1e+30 }
 0xd15   :  { %v1313_v32 = vpop.f32.mrf.mxu1  ;;  %v1471_v24 = vsel %vm559_vm5, %v1467_v23, -inf }
 0xd16   :  { %1472 = vmax.xlane.f32.xlu0 %v1471_v24 }
 0xd17   :  { %v2529_v25 = vpop.f32.mrf.mxu1 }
 0xd19   :  { %v1359_v26 = vpop.f32.mrf.mxu0 }
 0xd1a   :  { %v1464_v27 = vmul.f32 0.25, %v1359_v26 }
 0xd1b   :  { %v2534_v30 = vpop.f32.mrf.mxu0 }
 0xd1c   :  { %v1468_v33 = vsel %vm3212_vm6, %v1464_v27, -1e+30 }
 0xd1d   :  { %v1362_v34 = vpop.f32.mrf.mxu0  ;;  %v1474_v35 = vsel %vm559_vm5, %v1468_v33, -inf }
 0xd1e   :  { %1475 = vmax.xlane.f32.xlu1 %v1474_v35  ;;  %v2657_v35 = vld [vmem:[%s3540_s6 + $0x10] sm:$0xff]  }
 0xd1f   :  { %v2535_v36 = vpop.f32.mrf.mxu0 }
 0xd20   :  { %v2658_v36 = vld [vmem:[%s3540_s6 + $0x18] sm:$0xff]  }
 0xd8c   :  { %v1408_v37 = vpop.f32.mrf.mxu1 }
 0xd8d   :  { %v1465_v39 = vmul.f32 0.25, %v1408_v37 }
 0xd8e   :  { %v2540_v9 = vpop.f32.mrf.mxu1 }
 0xd8f   :  { %v1469_v38 = vsel %vm272_vm7, %v1465_v39, -1e+30 }
 0xd90   :  { %v1411_v40 = vpop.f32.mrf.mxu1  ;;  %v1457_v41 = vpop.f32.mrf.mxu0  ;;  %v1477_v42 = vsel %vm559_vm5, %v1469_v38, -inf }
 0xd91   :  { %v1466_v44 = vmul.f32 0.25, %v1457_v41  ;;  %1478 = vmax.xlane.f32.xlu0 %v1477_v42 }
 0xd92   :  { %v2541_v45 = vpop.f32.mrf.mxu1  ;;  %v2546_v18 = vpop.f32.mrf.mxu0 }
 0xd93   :  { %v1470_v46 = vsel %vm273_vm8, %v1466_v44, -1e+30 }
 0xd94   :  { %v1460_v47 = vpop.f32.mrf.mxu0  ;;  %v1480_v48 = vsel %vm559_vm5, %v1470_v46, -inf }
 0xd95   :  { %1481 = vmax.xlane.f32.xlu0 %v1480_v48 }
 0xd96   :  { %v2547_v49 = vpop.f32.mrf.mxu0 }
 0xd9f   :  { %v1473_v50 = vpop.xlane.xlu0 %1472 }
 0xda0   :  { %v1483_v53 = vsub.f32 %v1467_v23, %v1473_v50 }
 0xda2   :  { %v1487_v28 = vmul.f32 1.442695, %v1483_v53 }
 0xda4   :  { %2699 = vpow2.f32 %v1487_v28 }
 0xda7   :  { %v1476_v54 = vpop.xlane.xlu1 %1475 }
 0xda8   :  { %v1484_v55 = vsub.f32 %v1468_v33, %v1476_v54 }
 0xdaa   :  { %v1489_v56 = vmul.f32 1.442695, %v1484_v55 }
 0xdac   :  { %2701 = vpow2.f32 %v1489_v56 }
 0xdb1   :  { %v2700_v57 = vpop.eup %2699 }
 0xdb2   :  { %v1495_v61 = vsel %vm559_vm5, %v2700_v57, 0.0 }
 0xdb3   :  { %1496 = vadd.xlane.f32.xlu0 %v1495_v61 }
 0xdb9   :  { %v2702_v62 = vpop.eup %2701 }
 0xdba   :  { %v1498_v29 = vsel %vm559_vm5, %v2702_v62, 0.0 }
 0xdbb   :  { %1499 = vadd.xlane.f32.xlu1 %v1498_v29 }
 0xdcc   :  { %1567 = vrot.lane.b32.xlu1 %v3355_v7, %s2982_s1 }
 0xdd0   :  { %1615 = vrot.lane.b32.xlu1 %v3361_v14, %s2982_s1 }
 0xe1a   :  { %v1479_v63 = vpop.xlane.xlu0 %1478 }
 0xe1b   :  { %v1485_v0 = vsub.f32 %v1469_v38, %v1479_v63 }
 0xe1d   :  { %v1491_v1 = vmul.f32 1.442695, %v1485_v0  ;;  %v2328_v0 = vld [vmem:[#allocation11 + $0x1] ss:$0 sm:$0xff] }
 0xe1e   :  { %v1482_v3 = vpop.xlane.xlu0 %1481 }
 0xe1f   :  { %2703 = vpow2.f32 %v1491_v1  ;;  %v1486_v4 = vsub.f32 %v1470_v46, %v1482_v3 }
 0xe21   :  { %v1493_v5 = vmul.f32 1.442695, %v1486_v4 }
 0xe23   :  { %2705 = vpow2.f32 %v1493_v5 }
 0xe2c   :  { %v2704_v6 = vpop.eup %2703 }
 0xe2d   :  { %v1501_v8 = vsel %vm559_vm5, %v2704_v6, 0.0 }
 0xe2e   :  { %1502 = vadd.xlane.f32.xlu0 %v1501_v8 }
 0xe30   :  { %v2706_v10 = vpop.eup %2705 }
 0xe31   :  { %v1504_v11 = vsel %vm559_vm5, %v2706_v10, 0.0 }
 0xe32   :  { %1505 = vadd.xlane.f32.xlu1 %v1504_v11 }
 0xe43   :  { %1663 = vrot.lane.b32.xlu1 %v3370_v17, %s2982_s1  ;;  %v1497_v17 = vpop.xlane.xlu0 %1496 }
 0xe44   :  { %v1500_v7 = vpop.xlane.xlu1 %1499  ;;  %1519 = vrot.lane.b32.xlu0 %v3350_v2, %s2982_s1 }
 0xe45   :  { %2707 = vrcp.f32 %v1500_v7 }
 0xe46   :  { %2709 = vrcp.f32 %v1497_v17 }
 0xe48   :  { %v1568_v12 = vpop.permute.xlu1 %1567 }
 0xe49   :  { %v1573_v13 = vsel %vm613_vm9, %v1568_v12, 0 }
 0xe4a   :  { %2555 = vmatpush3.bf16.msra.mxu0 %v1573_v13 }
 0xe4b   :  { %2566 = vmatprep.subr.bf16.mxu0 %v2977_v15 }
 0xe4c   :  { %v1616_v43 = vpop.permute.xlu1 %1615 }
 0xe4d   :  { %v1621_v32 = vsel %vm613_vm9, %v1616_v43, 0 }
 0xe52   :  { %v2708_v14 = vpop.eup %2707 }
 0xe53   :  { %v1512_v16 = vmul.f32 %v2708_v14, %v2702_v62  ;;  %v2710_v51 = vpop.eup %2709 }
 0xe54   :  { %v1511_v19 = vmul.f32 %v2710_v51, %v2700_v57 }
 0xe55   :  { %v1516_v52 = vpack.c.bf16 %v1512_v16, %v1512_v16 }
 0xe56   :  { %v1515_v31 = vpack.c.bf16 %v1511_v19, %v1511_v19 }
 0xe57   :  { %2557 = vmatmul.mubr.msk.bf16.vlgmr.msra.gmra.mxu0 %vm559_vm5, %v1516_v52 }
 0xe58   :  { %2568 = vmatprep.mubr.msk.bf16.mxu0 %vm2978_vm1, %v2977_v15 }
 0xeb7   :  { %v1503_v2 = vpop.xlane.xlu0 %1502 }
 0xeb8   :  { %2711 = vrcp.f32 %v1503_v2 }
 0xebb   :  { %v1506_v20 = vpop.xlane.xlu1 %1505  ;;  %v1520_v21 = vpop.permute.xlu0 %1519 }
 0xebc   :  { %2713 = vrcp.f32 %v1506_v20  ;;  %v1525_v22 = vsel %vm613_vm9, %v1520_v21, 0 }
 0xebd   :  { %2549 = vmatpush3.bf16.msra.mxu1 %v1525_v22 }
 0xebe   :  { %2560 = vmatprep.subr.bf16.mxu1 %v2977_v15 }
 0xebf   :  { %v1664_v23 = vpop.permute.xlu1 %1663 }
 0xec0   :  { %v1669_v24 = vsel %vm613_vm9, %v1664_v23, 0  ;;  %2551 = vmatmul.mubr.msk.bf16.vlgmr.msra.gmra.mxu1 %vm559_vm5, %v1515_v31  ;;  %v2660_v31 = vld [vmem:[%s3544_s10 + $0x10] sm:$0xff]  }
 0xec1   :  { %2561 = vmatpush3.bf16.msra.mxu1 %v1621_v32  ;;  %2567 = vmatpush3.bf16.msra.mxu0 %v1669_v24 }
 0xec2   :  { %2562 = vmatprep.mubr.msk.bf16.mxu1 %vm2978_vm1, %v2977_v15  ;;  %2572 = vmatprep.subr.bf16.mxu1 %v2977_v15 }
 0xec3   :  { %2578 = vmatprep.subr.bf16.mxu0 %v2977_v15 }
 0xec5   :  { %v2712_v25 = vpop.eup %2711 }
 0xec6   :  { %v1513_v26 = vmul.f32 %v2712_v25, %v2704_v6 }
 0xec8   :  { %v1517_v27 = vpack.c.bf16 %v1513_v26, %v1513_v26 }
 0xec9   :  { %v2714_v30 = vpop.eup %2713 }
 0xeca   :  { %2563 = vmatmul.mubr.msk.bf16.vlgmr.msra.gmra.mxu1 %vm559_vm5, %v1517_v27  ;;  %v1514_v33 = vmul.f32 %v2714_v30, %v2706_v10 }
 0xecb   :  { %2574 = vmatprep.mubr.msk.bf16.mxu1 %vm2978_vm1, %v2977_v15  ;;  %2573 = vmatpush3.bf16.msra.mxu1 %v2657_v35 }
 0xecc   :  { %v1518_v34 = vpack.c.bf16 %v1514_v33, %v1514_v33  ;;  %2584 = vmatprep.subr.bf16.mxu1 %v2977_v15 }
 0xece   :  { %2569 = vmatmul.mubr.msk.bf16.vlgmr.msra.gmra.mxu0 %vm559_vm5, %v1518_v34  ;;  %v2329_v34 = vld [vmem:[#allocation13 + $0x1] ss:$0 sm:$0xff] }
 0xecf   :  { %2580 = vmatprep.mubr.msk.bf16.mxu0 %vm2978_vm1, %v2977_v15  ;;  %2579 = vmatpush3.bf16.msra.mxu0 %v2658_v36 }
 0xed0   :  { %2592 = vmatprep.subr.bf16.mxu0 %v2977_v15 }
 0xf17   :  { %v1609_v37 = vpop.f32.mrf.mxu0 }
 0xf19   :  { %v2558_v39 = vpop.f32.mrf.mxu0 }
 0xf1a   :  { %v2330_v39 = vld [vmem:[#allocation14 + $0x1] ss:$0 sm:$0xff] }
 0xf1b   :  { %v1612_v9 = vpop.f32.mrf.mxu0 }
 0xf1d   :  { %v2559_v38 = vpop.f32.mrf.mxu0 }
 0xf80   :  { %v1561_v40 = vpop.f32.mrf.mxu1 }
 0xf81   :  { %v1711_v41 = vpack.c.bf16 %v1609_v37, %v1561_v40 }
 0xf82   :  { %v2552_v42 = vpop.f32.mrf.mxu1 }
 0xf83   :  { %2575 = vmatmul.mubr.msk.bf16.vlgmr.msra.gmra.mxu1 %vm357_vm2, %v1711_v41  ;;  %v2661_v42 = vld [vmem:[%s3546_s12 + $0x38] sm:$0xff]  }
 0xf84   :  { %v1564_v44 = vpop.f32.mrf.mxu1  ;;  %2588 = vmatprep.mubr.msk.bf16.mxu1 %vm2978_vm1, %v2977_v15 }
 0xf85   :  { %v2662_v44 = vld [vmem:[%s3546_s12 + $0x30] sm:$0xff]  }
 0xf86   :  { %v2553_v45 = vpop.f32.mrf.mxu1 }
 0xf87   :  { %v2663_v45 = vld [vmem:[%s3546_s12 + $0x28] sm:$0xff]  }
 0xf8a   :  { %v1657_v18 = vpop.f32.mrf.mxu1 }
 0xf8c   :  { %v2564_v46 = vpop.f32.mrf.mxu1 }
 0xf8d   :  { %v2336_v46 = vld [vmem:[%s3545_s11 + $0x1] ss:$0 sm:$0xff] }
 0xf8e   :  { %v1660_v47 = vpop.f32.mrf.mxu1  ;;  %v1705_v48 = vpop.f32.mrf.mxu0 }
 0xf8f   :  { %v1712_v49 = vpack.c.bf16 %v1705_v48, %v1657_v18  ;;  %v2664_v18 = vld [vmem:[%s3546_s12 + $0x20] sm:$0xff]  }
 0xf90   :  { %v2565_v50 = vpop.f32.mrf.mxu1  ;;  %v2570_v53 = vpop.f32.mrf.mxu0 }
 0xf91   :  { %2581 = vmatmul.mubr.msk.bf16.vlgmr.msra.gmra.mxu0 %vm357_vm2, %v1712_v49 }
 0xf92   :  { %v1708_v28 = vpop.f32.mrf.mxu0  ;;  %2600 = vmatprep.mubr.msk.bf16.mxu0 %vm2978_vm1, %v2977_v15  ;;  %2593 = vmatpush3.bf16.msra.mxu0 %v2661_v42  ;;  %v2358_v42 = vld [vmem:[%s3549_s15 + $0x1] ss:$0 sm:$0xff] }
 0xf93   :  { %2594 = vmatprep.subr.bf16.mxu0 %v2977_v15 }
 0xf94   :  { %v2571_v54 = vpop.f32.mrf.mxu0 }
 0xf96   :  { %2595 = vmatpush3.bf16.msra.mxu0 %v2662_v44 }
 0xf97   :  { %2596 = vmatprep.subr.bf16.mxu0 %v2977_v15 }
 0xf9a   :  { %2597 = vmatpush3.bf16.msra.mxu0 %v2663_v45 }
 0xf9b   :  { %2598 = vmatprep.subr.bf16.mxu0 %v2977_v15 }
 0xf9e   :  { %2599 = vmatpush3.bf16.msra.mxu0 %v2664_v18 }
0x1043   :  { %v1761_v55 = vpop.f32.mrf.mxu1 }
0x1044   :  { %v1818_v29 = vsel %vm175_vm0, %v1761_v55, 0.0 }
0x1045   :  { %v2576_v56 = vpop.f32.mrf.mxu1 }
0x1047   :  { %v1764_v57 = vpop.f32.mrf.mxu1 }
0x1048   :  { %v1821_v6 = vsel %vm175_vm0, %v1764_v57, 0.0 }
0x1049   :  { %v2577_v61 = vpop.f32.mrf.mxu1 }
0x1051   :  { %v1811_v62 = vpop.f32.mrf.mxu0 }
0x1052   :  { %v1819_v63 = vsel %vm175_vm0, %v1811_v62, 0.0 }
0x1053   :  { %v1820_v1 = vadd.f32 %v1819_v63, %v1818_v29  ;;  %v2582_v3 = vpop.f32.mrf.mxu0 }
0x1055   :  { %v1832_v4 = vadd.f32 %v2328_v0, %v1820_v1  ;;  %v1814_v5 = vpop.f32.mrf.mxu0 }
0x1056   :  { %v1822_v8 = vsel %vm175_vm0, %v1814_v5, 0.0 }
0x1057   :  { %v1823_v10 = vadd.f32 %v1822_v8, %v1821_v6  ;;  %v2583_v11 = vpop.f32.mrf.mxu0  ;;  %v1834_v7 = vadd.f32 %v1832_v4, %v3341_v58 }
0x1059   :  { %v1833_v12 = vadd.f32 %v2328_v0, %v1823_v10  ;;  %v1840_v13 = vsel %vm175_vm0, %v1834_v7, 0.0 }
0x105a   :  { %1841 = vadd.xlane.f32.xlu0 %v1840_v13  ;;  %v2349_v13 = vld [vmem:[%s3547_s13 + $0x1] ss:$0 sm:$0xff] }
0x105b   :  { %v1835_v14 = vadd.f32 %v1833_v12, %v3343_v60  ;;  %v2659_v60 = vld [vmem:[%s3544_s10 + $0x18] sm:$0xff]   ;;  %s2228_s10 = sshll.u32 %s2984_s2, 4  ;;  %s2229_s10 = int_to_ptr.vmem [resolvable:$true] %s2228_s10 }
0x105c   :  { %2585 = vmatpush3.bf16.msra.mxu1 %v2659_v60 }
0x105d   :  { %v1843_v16 = vsel %vm175_vm0, %v1835_v14, 0.0  ;;  %2586 = vmatprep.subr.bf16.mxu1 %v2977_v15 }
0x105e   :  { %1844 = vadd.xlane.f32.xlu1 %v1843_v16 }
0x1060   :  { %2587 = vmatpush3.bf16.msra.mxu1 %v2660_v31 }
0x1061   :  { %2604 = vmatprep.subr.bf16.mxu1 %v2977_v15 }
0x10e3   :  { %v1842_v52 = vpop.xlane.xlu0 %1841 }
0x10e4   :  { %v1846_v17 = vmul.f32 0.03125, %v1842_v52 }
0x10e6   :  { %v1848_v51 = vsub.f32 %v1834_v7, %v1846_v17 }
0x10e7   :  { %v1845_v43 = vpop.xlane.xlu1 %1844 }
0x10e8   :  { %v1847_v2 = vmul.f32 0.03125, %v1845_v43  ;;  %v1850_v19 = vmul.f32 %v1848_v51, %v1848_v51 }
0x10ea   :  { %v1849_v20 = vsub.f32 %v1835_v14, %v1847_v2  ;;  %v1852_v21 = vsel %vm175_vm0, %v1850_v19, 0.0 }
0x10eb   :  { %1853 = vadd.xlane.f32.xlu0 %v1852_v21 }
0x10ec   :  { %v1851_v58 = vmul.f32 %v1849_v20, %v1849_v20 }
0x10ee   :  { %v1855_v22 = vsel %vm175_vm0, %v1851_v58, 0.0 }
0x10ef   :  { %1856 = vadd.xlane.f32.xlu0 %v1855_v22 }
0x1174   :  { %v1854_v23 = vpop.xlane.xlu0 %1853 }
0x1175   :  { %v1858_v32 = vmul.f32 0.03125, %v1854_v23 }
0x1177   :  { %v1860_v24 = vadd.f32 1e-12, %v1858_v32 }
0x1178   :  { %v1857_v25 = vpop.xlane.xlu0 %1856 }
0x1179   :  { %2715 = vrsqrt.f32 %v1860_v24  ;;  %v1859_v26 = vmul.f32 0.03125, %v1857_v25 }
0x117b   :  { %v1861_v27 = vadd.f32 1e-12, %v1859_v26 }
0x117d   :  { %2717 = vrsqrt.f32 %v1861_v27 }
0x1186   :  { %v2716_v30 = vpop.eup %2715 }
0x1187   :  { %v1864_v33 = vmul.f32 %v2716_v30, %v1848_v51  ;;  %v2665_v30 = vld [vmem:[%s3550_s16 + $0x8] sm:$0xff]  }
0x1189   :  { %v1872_v37 = vmul.f32 %v2329_v34, %v1864_v33  ;;  %v2666_v33 = vld [vmem:[%s3550_s16] sm:$0xff]  }
0x118a   :  { %v2718_v35 = vpop.eup %2717 }
0x118b   :  { %v1865_v36 = vmul.f32 %v2718_v35, %v1849_v20  ;;  %v1880_v38 = vadd.f32 %v2330_v39, %v1872_v37 }
0x118d   :  { %v1873_v9 = vmul.f32 %v2329_v34, %v1865_v36 }
0x118f   :  { %v1881_v40 = vadd.f32 %v2330_v39, %v1873_v9 }
0x1191   :  { %v1882_v41 = vpack.c.bf16 %v1881_v40, %v1880_v38 }
0x1193   :  { %2589 = vmatmul.mubr.msk.bf16.vlgmr.msra.gmra.mxu1 %vm175_vm0, %v1882_v41 }
0x1194   :  { %2608 = vmatprep.mubr.msk.bf16.mxu1 %vm2978_vm1, %v2977_v15  ;;  %2605 = vmatpush3.bf16.msra.mxu1 %v2665_v30 }
0x1195   :  { %2606 = vmatprep.subr.bf16.mxu1 %v2977_v15 }
0x1198   :  { %2607 = vmatpush3.bf16.msra.mxu1 %v2666_v33 }
0x1253   :  { %v1945_v47 = vpop.f32.mrf.mxu1 }
0x1254   :  { %v1946_v48 = vadd.f32 %v2336_v46, %v1945_v47 }
0x1255   :  { %v2590_v49 = vpop.f32.mrf.mxu1 }
0x1256   :  { %v1952_v50 = vmul.f32 %v1946_v48, %v1946_v48 }
0x1257   :  { %v1948_v53 = vpop.f32.mrf.mxu1 }
0x1258   :  { %v1954_v28 = vmul.f32 %v1952_v50, %v1946_v48  ;;  %v1949_v54 = vadd.f32 %v2336_v46, %v1948_v53 }
0x1259   :  { %v2591_v55 = vpop.f32.mrf.mxu1 }
0x125a   :  { %v1956_v56 = vmul.f32 0.044715, %v1954_v28  ;;  %v1953_v57 = vmul.f32 %v1949_v54, %v1949_v54 }
0x125c   :  { %v1958_v61 = vadd.f32 %v1956_v56, %v1946_v48  ;;  %v1955_v62 = vmul.f32 %v1953_v57, %v1949_v54  ;;  %v2184_v56 = vand.u32 127, %v229_v59  ;;  %v2359_v57 = vld [vmem:[%s3551_s17] ss:$0 sm:$0xff]  ;;  %s2983_s17 = smov [#allocation17]  }
0x125e   :  { %v1960_v29 = vmul.f32 0.7978846, %v1958_v61  ;;  %v1957_v63 = vmul.f32 0.044715, %v1955_v62  ;;  %vm2185_vm12 = vcmp.lt.s32.totalorder %v2184_v56, 3 }
0x1260   :  { %2719 = vtanh.f32 %v1960_v29  ;;  %v1959_v0 = vadd.f32 %v1957_v63, %v1949_v54  ;;  %v2201_v29 = vld [vmem:[%s3552_s18] sm:$0x3]  ;;  %s2241_s18 = sshll.u32 %s2983_s17, 4  ;;  %s2242_s18 = int_to_ptr.vmem [resolvable:$true] %s2241_s18 }
0x1261   :  { %s2891_s27 = scalar_lea.vmem %s2242_s18, 32  ;;  %p2896_p13 = scmp.lt.s32.totalorder %s2242_s18, %s2242_s18 }
0x1262   :  { %v1961_v1 = vmul.f32 0.7978846, %v1959_v0  ;;  %p2892_p12 = scmp.ne.s32.totalorder %s2242_s18, %s2891_s27  ;;  %p2897_p0 = scmp.lt.s32.totalorder %s2891_s27, %s2891_s27 }
0x1264   :  { %2721 = vtanh.f32 %v1961_v1  ;;  %p2898_p1 = por %p2897_p0, %p2896_p13 }
0x1266   :  { %p2899_p2 = pnand %p2898_p1, %p2892_p12 }
0x126d   :  { %v2720_v3 = vpop.eup %2719 }
0x126e   :  { %v1964_v4 = vadd.f32 1.0, %v2720_v3 }
0x1270   :  { %v1966_v6 = vmul.f32 0.5, %v1964_v4 }
0x1271   :  { %v2722_v5 = vpop.eup %2721 }
0x1272   :  { %v1965_v8 = vadd.f32 1.0, %v2722_v5  ;;  %v1968_v11 = vmul.f32 %v1966_v6, %v1946_v48 }
0x1274   :  { %v1967_v10 = vmul.f32 0.5, %v1965_v8 }
0x1276   :  { %v1969_v7 = vmul.f32 %v1967_v10, %v1949_v54 }
0x1278   :  { %v1970_v12 = vpack.c.bf16 %v1969_v7, %v1968_v11 }
0x127a   :  { %2601 = vmatmul.mubr.msk.bf16.vlgmr.msra.gmra.mxu0 %vm1094_vm10, %v1970_v12 }
0x133a   :  { %v2049_v14 = vpop.f32.mrf.mxu0 }
0x133b   :  { %v2050_v16 = vadd.f32 %v2349_v13, %v2049_v14 }
0x133c   :  { %v2602_v52 = vpop.f32.mrf.mxu0 }
0x133d   :  { %v2056_v17 = vadd.f32 %v2050_v16, %v1880_v38 }
0x133e   :  { %v2052_v51 = vpop.f32.mrf.mxu0 }
0x133f   :  { %v2053_v43 = vadd.f32 %v2349_v13, %v2052_v51  ;;  %v2062_v2 = vsel %vm175_vm0, %v2056_v17, 0.0 }
0x1340   :  { %2063 = vadd.xlane.f32.xlu1 %v2062_v2  ;;  %v2603_v19 = vpop.f32.mrf.mxu0 }
0x1341   :  { %v2057_v20 = vadd.f32 %v2053_v43, %v1881_v40  ;;  %v2357_v40 = vld [vmem:[%s3548_s14 + $0x1] ss:$0 sm:$0xff] }
0x1343   :  { %v2065_v21 = vsel %vm175_vm0, %v2057_v20, 0.0 }
0x1344   :  { %2066 = vadd.xlane.f32.xlu0 %v2065_v21 }
0x13c9   :  { %v2064_v58 = vpop.xlane.xlu1 %2063 }
0x13ca   :  { %v2068_v22 = vmul.f32 0.03125, %v2064_v58 }
0x13cc   :  { %v2070_v60 = vsub.f32 %v2056_v17, %v2068_v22 }
0x13cd   :  { %v2067_v31 = vpop.xlane.xlu0 %2066 }
0x13ce   :  { %v2069_v23 = vmul.f32 0.03125, %v2067_v31  ;;  %v2072_v32 = vmul.f32 %v2070_v60, %v2070_v60 }
0x13d0   :  { %v2071_v24 = vsub.f32 %v2057_v20, %v2069_v23  ;;  %v2074_v25 = vsel %vm175_vm0, %v2072_v32, 0.0 }
0x13d1   :  { %2075 = vadd.xlane.f32.xlu1 %v2074_v25 }
0x13d2   :  { %v2073_v26 = vmul.f32 %v2071_v24, %v2071_v24 }
0x13d4   :  { %v2077_v27 = vsel %vm175_vm0, %v2073_v26, 0.0 }
0x13d5   :  { %2078 = vadd.xlane.f32.xlu0 %v2077_v27 }
0x145a   :  { %v2076_v34 = vpop.xlane.xlu1 %2075 }
0x145b   :  { %v2080_v35 = vmul.f32 0.03125, %v2076_v34 }
0x145d   :  { %v2082_v36 = vadd.f32 1e-12, %v2080_v35 }
0x145e   :  { %v2079_v37 = vpop.xlane.xlu0 %2078 }
0x145f   :  { %2723 = vrsqrt.f32 %v2082_v36  ;;  %v2081_v39 = vmul.f32 0.03125, %v2079_v37 }
0x1461   :  { %v2083_v9 = vadd.f32 1e-12, %v2081_v39 }
0x1463   :  { %2725 = vrsqrt.f32 %v2083_v9 }
0x146c   :  { %v2724_v38 = vpop.eup %2723 }
0x146d   :  { %v2086_v41 = vmul.f32 %v2724_v38, %v2070_v60 }
0x146f   :  { %v2094_v15 = vmul.f32 %v2357_v40, %v2086_v41 }
0x1470   :  { %v2726_v44 = vpop.eup %2725 }
0x1471   :  { %v2087_v45 = vmul.f32 %v2726_v44, %v2071_v24  ;;  %v2102_v18 = vadd.f32 %v2358_v42, %v2094_v15 }
0x1473   :  { %v2095_v46 = vmul.f32 %v2357_v40, %v2087_v45  ;;  %2104 = vst.msk [vmem:[#allocation16] sm:$0xff] %vm175_vm0, %v2102_v18  ;;  %v2106_v48 = vpack.c.bf16 %v2102_v18, %v2102_v18 }
0x1475   :  { %v2103_v47 = vadd.f32 %v2358_v42, %v2095_v46  ;;  %v2121_v53 = vunpack.c.l.b16 %v2106_v48 }
0x1477   :  { %2105 = vst.msk [vmem:[#allocation16 + $0x8] sm:$0xff] %vm175_vm0, %v2103_v47  ;;  %v2107_v49 = vpack.c.bf16 %v2103_v47, %v2103_v47 }
0x1479   :  { %v2122_v50 = vunpack.c.l.b16 %v2107_v49 }
0x147b   :  { %v2123_v28 = vrot.slane %v2122_v50, 7 }
0x147d   :  { %v2125_v54 = vsel %vm2124_vm11, %v2123_v28, %v2121_v53 }
0x147e   :  { %v2126_v55 = vpack.c.b16 %v2125_v54, %v2125_v54 }
0x1480   :  { %2609 = vmatmul.mubr.msk.bf16.vlgmr.msra.gmra.mxu1 %vm175_vm0, %v2126_v55 }
0x1540   :  { %v2176_v61 = vpop.f32.mrf.mxu1 }
0x1541   :  { %v2177_v62 = vadd.f32 %v2359_v57, %v2176_v61 }
0x1542   :  { %v2610_v63 = vpop.f32.mrf.mxu1 }
0x1543   :  { %2182 = vst [vmem:[#allocation17] sm:$0x3] %v2177_v62  ;;  %v2188_v0 = vsel %vm2185_vm12, %v2177_v62, -1e+30  ;;  %v2202_v4 = vmul.f32 %v2201_v29, %v2177_v62 }
0x1544   :  { %v2179_v1 = vpop.f32.mrf.mxu1  ;;  %v2189_v3 = vsel %vm223_vm3, %v2188_v0, -inf }
0x1545   :  { %2190 = vmax.xlane.f32.xlu0 %v2189_v3  ;;  %v2203_v5 = vsel %vm223_vm3, %v2202_v4, 0.0 }
0x1546   :  { %v2611_v59 = vpop.f32.mrf.mxu1 }
0x1549   :  { %2204 = vadd.xlane.f32.xlu0 %v2203_v5 }
0x15ce   :  { %v2191_v6 = vpop.xlane.xlu0 %2190 }
0x15cf   :  { %v2192_v8 = vsub.f32 %v2188_v0, %v2191_v6 }
0x15d1   :  { %v2193_v10 = vmul.f32 1.442695, %v2192_v8 }
0x15d2   :  { %v2205_v52 = vpop.xlane.xlu0 %2204 }
0x15d3   :  { %2727 = vpow2.f32 %v2193_v10 }
0x15e0   :  { %v2728_v11 = vpop.eup %2727 }
0x15e1   :  { %v2195_v7 = vsel %vm223_vm3, %v2728_v11, 0.0 }
0x15e2   :  { %2196 = vadd.xlane.f32.xlu1 %v2195_v7 }
0x166b   :  { %v2197_v12 = vpop.xlane.xlu1 %2196 }
0x166c   :  { %2729 = vlog2.f32 %v2197_v12 }
0x1679   :  { %v2730_v13 = vpop.eup %2729 }
0x167a   :  { %v2199_v14 = vmul.f32 0.6931472, %v2730_v13 }
0x167c   :  { %v2200_v16 = vadd.f32 %v2199_v14, %v2191_v6 }
0x167e   :  { %v2206_v17 = vsub.f32 %v2200_v16, %v2205_v52 }
0x1680   :  { %v2208_v51 = vsel %vm2207_vm13, %v2206_v17, 0.0 }
0x1681   :  { %2209 = vadd.xlane.f32.xlu1 %v2208_v51 }
0x1682   :  { %2902 = shalt.err (!%p2899_p2)
}
0x1683   :  { %2244 = dma.vmem_to_hbm [thread:$0]  %s2242_s18, 32, %s3554_s20, [#allocation18]  }
0x1684   :  { %s2911_s5 = scalar_lea.vmem %s2229_s10, 256  ;;  %p2916_p4 = scmp.lt.s32.totalorder %s2229_s10, %s2229_s10 }
0x1685   :  { %p2912_p3 = scmp.ne.s32.totalorder %s2229_s10, %s2911_s5  ;;  %p2917_p5 = scmp.lt.s32.totalorder %s2911_s5, %s2911_s5 }
0x1687   :  { %p2918_p6 = por %p2917_p5, %p2916_p4 }
0x1689   :  { %p2919_p7 = pnand %p2918_p6, %p2912_p3 }
0x168b   :  { %2922 = shalt.err (!%p2919_p7)
}
0x168c   :  { %s3577_s8 = smov 128   ;;  %s2985_s20 = smov [#allocation19]   ;;  %vm2221_vm14 = vcmask 0  }
0x168d   :  { %2234 = dma.vmem_to_hbm [thread:$0]  %s2229_s10, 256, %s3553_s19, [#allocation4], %s3577_s8, %s3577_s8, %s2972_s30  }
0x168e   :  { %s2251_s26 = sshll.u32 %s2985_s20, 4  ;;  %s2252_s26 = int_to_ptr.vmem [resolvable:$true] %s2251_s26 }
0x168f   :  { %s2931_s11 = scalar_lea.vmem %s2252_s26, 16  ;;  %s2935_s12 = scalar_lea.vmem %s2252_s26, 32 }
0x1690   :  { %p2932_p8 = scmp.ne.s32.totalorder %s2252_s26, %s2931_s11  ;;  %p2936_p9 = scmp.lt.s32.totalorder %s2252_s26, %s2252_s26 }
0x1691   :  { %p2937_p10 = scmp.lt.s32.totalorder %s2935_s12, %s2931_s11 }
0x1693   :  { %p2938_p11 = por %p2937_p10, %p2936_p9 }
0x1695   :  { %p2939_p12 = pnand %p2938_p11, %p2932_p8 }
0x170a   :  { %v2210_v43 = vpop.xlane.xlu1 %2209 }
0x170b   :  { %v2211_v2 = vrot.slane %v2210_v43, 4 }
0x170d   :  { %v2212_v19 = vadd.f32 %v2211_v2, %v2210_v43 }
0x170f   :  { %v2213_v20 = vrot.slane %v2212_v19, 2 }
0x1711   :  { %v2214_v21 = vadd.f32 %v2213_v20, %v2212_v19 }
0x1713   :  { %v2215_v58 = vrot.slane %v2214_v21, 1 }
0x1715   :  { %v2216_v22 = vadd.f32 %v2215_v58, %v2214_v21 }
0x1717   :  { %2612 = vpush %v2216_v22 }
0x1748   :  { %s2613_s28 = spop %2612 }
0x1749   :  { %v2218_v60 = vstv %s2613_s28 }
0x174a   :  { %v2220_v31 = vmul.f32 0.5, %v2218_v60 }
0x174c   :  { %2222 = vst.msk [vmem:[#allocation19] sm:$0x1] %vm2221_vm14, %v2220_v31 }
0x174d   :  { %2942 = shalt.err (!%p2939_p12)
}
0x174e   :  { %2254 = dma.vmem_to_hbm [thread:$0]  %s2252_s26, 16, %s3555_s21, [#allocation18]  }
0x174f   :  { %2961 = dma.done.wait [#allocation4], 256  }
0x1750   :  { %2962 = vsyncadd [#allocation4], 4294967040 }
0x1751   :  { %2963 = dma.done.wait [#allocation18], 48  }
0x1752   :  { %2964 = vsyncadd [#allocation18], 4294967248 }
0x1753   :  { %2264 = vsyncpa [#allocation3], 1 }
0x1754   :  { %2265 = vsyncpa [#allocation6], 1 }
0x1755   :  { %2266 = vsyncpa [#allocation9], 1 }
0x1756   :  { %2267 = vsyncpa [#allocation12], 1 }
0x1757   :  { %2268 = vsyncpa [#allocation15], 1 }
0x1758   :  { %2269 = vsyncpa [#allocation4], 1 }
0x1759   :  { %2270 = vsyncpa [#allocation18], 1 }

</bundles_post_ra>
